<compile_context>
chip_gen: v7x
topology: tpu7x:2x2x1
jax: 0.10.0
libtpu: 0.0.40
codegen_flags: <defaults>
</compile_context>

<pallas_src>
import functools

import jax
import jax.numpy as jnp
from jax.experimental import pallas as pl
from jax.experimental.pallas import tpu as pltpu


def _flowhead_kernel(x_ref, w1_ref, b1_ref, w2_ref, b2_ref, m_ref,
                     o_ref, hid_ref, *, w, tile_h, im2col):
    """One (batch, H-tile) grid step of fused conv1+ReLU+conv2.

    x_ref : (1, (H+6)*(W+4), Cin)  f32   zero-padded image, rows flattened
    w1_ref: (9*Cin, Hid) bf16 (im2col)  or  (9, Cin, Hid) bf16 (fallback)
    b1_ref: (1, Hid) f32
    w2_ref: (9, Hid, 2) bf16
    b2_ref: (1, 2) f32
    m_ref : ((H+6)*(W+4), 1) bf16   1.0 inside the original HxW image, else 0.0
    o_ref : (1, TILE_H*(W+4), 2)    output rows (incl. junk right-halo cols)
    hid_ref: ((TILE_H+3)*(W+4), Hid) f32 VMEM scratch — conv1 activation
    """
    wp = w + 4                      # flat row stride of the padded image
    th = tile_h
    n_hid = (th + 3) * wp           # hidden pixels held per tile (with halo)
    n_out = th * wp                 # output pixels per tile (junk cols included)
    hid_dim = hid_ref.shape[-1]

    t = pl.program_id(1)
    base = pl.multiple_of(t * n_out, 8)   # flat offset of this tile's window

    # ---------------- conv1 (+ bias + ReLU), taps as flat-offset windows -----
    def tap_x(ky, kx):
        return x_ref[0, pl.ds(base + ky * wp + kx, n_hid), :]

    if im2col:
        # single big-K MXU matmul: K = 9*Cin (Cin is 128-aligned here)
        patch = jnp.concatenate(
            [tap_x(ky, kx).astype(jnp.bfloat16)
             for ky in range(3) for kx in range(3)], axis=-1)
        hid = jnp.dot(patch, w1_ref[...], preferred_element_type=jnp.float32)
    else:
        # lane-unaligned Cin (toy test): 9 tap matmuls accumulated in f32
        hid = jnp.zeros((n_hid, hid_dim), jnp.float32)
        for ky in range(3):
            for kx in range(3):
                hid = hid + jnp.dot(tap_x(ky, kx).astype(jnp.bfloat16),
                                    w1_ref[ky * 3 + kx],
                                    preferred_element_type=jnp.float32)

    hid = jnp.maximum(hid + b1_ref[...], 0.0)
    # zero every hidden pixel that lies outside the original HxW image, so the
    # fused conv2 sees exactly the zero padding nn.Conv2d(padding=1) implies.
    hid = hid * m_ref[pl.ds(base, n_hid), :]
    hid_ref[...] = hid              # conv1 activation: stays in VMEM, never HBM

    # ---------------- conv2: 9 row-shifted windows of the VMEM hidden --------
    acc = jnp.zeros((n_out, 2), jnp.float32)
    for ky in range(3):
        for kx in range(3):
            d = ky * wp + kx
            hslab = hid_ref[d:d + n_out, :].astype(jnp.bfloat16)
            acc = acc + jnp.dot(hslab, w2_ref[ky * 3 + kx],
                                preferred_element_type=jnp.float32)
    o_ref[0] = (acc + b2_ref[...]).astype(o_ref.dtype)


def flow_head(params, x_nchw, *, tile_h=8):
    """FlowHead forward. x_nchw: (B, input_dim, H, W) -> (B, 2, H, W)."""
    B, cin, H, W = x_nchw.shape
    hid_dim = params["w1"].shape[0]
    assert params["w1"].shape == (hid_dim, cin, 3, 3)
    assert params["w2"].shape == (2, hid_dim, 3, 3)

    th = tile_h if H % tile_h == 0 else H       # TILE_H must divide H
    n_tiles = H // th
    wp = W + 4
    use_im2col = (cin % 128 == 0)               # lane-aligned K pieces only

    # NCHW -> NHWC, pad rows by (2,4) and cols by (2,2), flatten (rows, cols).
    # (The extra bottom rows absorb the row-wrap of the flat-offset tap trick.)
    x = jnp.transpose(x_nchw, (0, 2, 3, 1))
    x_pad = jnp.pad(x, ((0, 0), (2, 4), (2, 2), (0, 0)))
    x_flat = x_pad.reshape(B, (H + 6) * wp, cin)

    # conv1 weights: (Hid,Cin,3,3) -> (3,3,Cin,Hid) -> per-tap / im2col, bf16.
    w1 = jnp.transpose(params["w1"], (2, 3, 1, 0)).reshape(9, cin, hid_dim)
    if use_im2col:
        w1 = w1.reshape(9 * cin, hid_dim)
        w1_spec = pl.BlockSpec((9 * cin, hid_dim), lambda b, t: (0, 0))
    else:
        w1_spec = pl.BlockSpec((9, cin, hid_dim), lambda b, t: (0, 0, 0))
    w1 = w1.astype(jnp.bfloat16)
    # conv2 weights: (2,Hid,3,3) -> (9, Hid, 2), bf16.
    w2 = jnp.transpose(params["w2"], (2, 3, 1, 0)).reshape(9, hid_dim, 2)
    w2 = w2.astype(jnp.bfloat16)
    b1 = params["b1"].reshape(1, hid_dim).astype(jnp.float32)
    b2 = params["b2"].reshape(1, 2).astype(jnp.float32)

    # validity mask over padded pixels (1 inside the original image, 0 in halo).
    pr = jnp.arange(H + 6)[:, None]
    pc = jnp.arange(wp)[None, :]
    mask = (((pr >= 1) & (pr <= H)) & ((pc >= 1) & (pc <= W)))
    mask = mask.astype(jnp.bfloat16).reshape((H + 6) * wp, 1)

    kernel = functools.partial(_flowhead_kernel, w=W, tile_h=th,
                               im2col=use_im2col)
    n_hid = (th + 3) * wp

    out_flat = pl.pallas_call(
        kernel,
        out_shape=jax.ShapeDtypeStruct((B, H * wp, 2), x_nchw.dtype),
        grid_spec=pltpu.PrefetchScalarGridSpec(
            num_scalar_prefetch=0,
            grid=(B, n_tiles),
            in_specs=[
                pl.BlockSpec((1, (H + 6) * wp, cin), lambda b, t: (b, 0, 0)),
                w1_spec,
                pl.BlockSpec((1, hid_dim), lambda b, t: (0, 0)),
                pl.BlockSpec((9, hid_dim, 2), lambda b, t: (0, 0, 0)),
                pl.BlockSpec((1, 2), lambda b, t: (0, 0)),
                pl.BlockSpec(((H + 6) * wp, 1), lambda b, t: (0, 0)),
            ],
            out_specs=pl.BlockSpec((1, th * wp, 2), lambda b, t: (b, t, 0)),
            scratch_shapes=[pltpu.VMEM((n_hid, hid_dim), jnp.float32)],
        ),
        compiler_params=pltpu.CompilerParams(
            dimension_semantics=("parallel", "parallel"),
            vmem_limit_bytes=32 * 1024 * 1024,
        ),
    )(x_flat, w1, b1, w2, b2, mask)

    # un-flatten, drop the junk right-halo columns, NHWC -> NCHW (XLA glue).
    out = out_flat.reshape(B, H, wp, 2)[:, :, :W, :]
    return jnp.transpose(out, (0, 3, 1, 2))


def init_flowhead_params(key, input_dim=128, hidden_dim=256, dtype=jnp.float32):
    """Deterministic synthetic parameters in PyTorch conv layout (Cout,Cin,3,3)."""
    k1, k2, k3, k4 = jax.random.split(key, 4)
    s1 = 1.0 / jnp.sqrt(input_dim * 9.0)
    s2 = 1.0 / jnp.sqrt(hidden_dim * 9.0)
    w1 = jax.random.uniform(k1, (hidden_dim, input_dim, 3, 3), dtype, -s1, s1)
    b1 = jax.random.uniform(k2, (hidden_dim,), dtype, -s1, s1)
    w2 = jax.random.uniform(k3, (2, hidden_dim, 3, 3), dtype, -s2, s2)
    b2 = jax.random.uniform(k4, (2,), dtype, -s2, s2)
    return {"w1": w1, "b1": b1, "w2": w2, "b2": b2}


def _flow_head_ref(params, x_nchw):
    """Pure-JAX reference (XLA convs) for correctness checking."""
    dn = jax.lax.conv_dimension_numbers(
        x_nchw.shape, params["w1"].shape, ("NCHW", "OIHW", "NCHW"))
    h = jax.lax.conv_general_dilated(
        x_nchw, params["w1"], (1, 1), "SAME", dimension_numbers=dn)
    h = jnp.maximum(h + params["b1"][None, :, None, None], 0.0)
    dn2 = jax.lax.conv_dimension_numbers(
        h.shape, params["w2"].shape, ("NCHW", "OIHW", "NCHW"))
    y = jax.lax.conv_general_dilated(
        h, params["w2"], (1, 1), "SAME", dimension_numbers=dn2)
    return y + params["b2"][None, :, None, None]


if __name__ == "__main__":
    # Small synthetic config: input_dim=4, hidden_dim=32, B=2, H=W=16.
    B, C_IN, HID, H, W = 2, 4, 32, 16, 16

    key = jax.random.PRNGKey(0)
    kx, kp = jax.random.split(key)
    x = jax.random.normal(kx, (B, C_IN, H, W), jnp.float32)   # NCHW like PyTorch
    params = init_flowhead_params(kp, input_dim=C_IN, hidden_dim=HID)

    out = jax.block_until_ready(flow_head(params, x))
    assert out.shape == (B, 2, H, W), out.shape

    ref = jax.block_until_ready(_flow_head_ref(params, x))
    # bf16 MXU operands with f32 accumulation -> loosened tolerance vs f32 ref.
    assert jnp.allclose(out, ref, atol=3e-2, rtol=3e-2), (
        float(jnp.max(jnp.abs(out - ref))))

    print("KERNEL_OK")
</pallas_src>

<mosaic_0001>
module attributes {stable_mosaic.version = 11 : i64} {
  func.func @_flowhead_kernel(%arg0: i32, %arg1: i32, %arg2: memref<1x440x4xf32, #tpu.memory_space<vmem>>, %arg3: memref<9x4x32xbf16, #tpu.memory_space<vmem>>, %arg4: memref<1x32xf32, #tpu.memory_space<vmem>>, %arg5: memref<9x32x2xbf16, #tpu.memory_space<vmem>>, %arg6: memref<1x2xf32, #tpu.memory_space<vmem>>, %arg7: memref<440x1xbf16, #tpu.memory_space<vmem>>, %arg8: memref<1x160x2xf32, #tpu.memory_space<vmem>>, %arg9: memref<220x32xf32, #tpu.memory_space<vmem>>) attributes {dimension_semantics = [#tpu.dimension_semantics<parallel>, #tpu.dimension_semantics<parallel>], iteration_bounds = array<i64: 2, 2>, scalar_prefetch = 0 : i64, scratch_operands = 1 : i64, tpu.core_type = #tpu.core_type<tc>, window_params = [{transform_indices = @transform_0, window_bounds = array<i64: 1, 440, 4>}, {pipeline_mode = #tpu.pipeline_mode<synchronous>, transform_indices = @transform_1, window_bounds = array<i64: 9, 4, 32>}, {pipeline_mode = #tpu.pipeline_mode<synchronous>, transform_indices = @transform_2, window_bounds = array<i64: 1, 32>}, {pipeline_mode = #tpu.pipeline_mode<synchronous>, transform_indices = @transform_3, window_bounds = array<i64: 9, 32, 2>}, {pipeline_mode = #tpu.pipeline_mode<synchronous>, transform_indices = @transform_4, window_bounds = array<i64: 1, 2>}, {pipeline_mode = #tpu.pipeline_mode<synchronous>, transform_indices = @transform_5, window_bounds = array<i64: 440, 1>}, {transform_indices = @transform_6, window_bounds = array<i64: 1, 160, 2>}]} {
    %c160_i32 = arith.constant 160 : i32
    %0 = arith.muli %arg1, %c160_i32 : i32
    %1 = tpu.assume_multiple %0, 8 : i32
    %cst = arith.constant 0.000000e+00 : f32
    %2 = vector.broadcast %cst : f32 to vector<220x32xf32>
    %c0_i32 = arith.constant 0 : i32
    %3 = arith.addi %1, %c0_i32 : i32
    %c0_i32_0 = arith.constant 0 : i32
    %4 = arith.addi %3, %c0_i32_0 : i32
    %c0 = arith.constant 0 : index
    %5 = arith.index_cast %4 : i32 to index
    %c0_1 = arith.constant 0 : index
    %6 = vector.load %arg2[%c0, %5, %c0_1] : memref<1x440x4xf32, #tpu.memory_space<vmem>>, vector<1x220x4xf32>
    %7 = vector.shape_cast %6 : vector<1x220x4xf32> to vector<220x4xf32>
    %8 = arith.truncf %7 : vector<220x4xf32> to vector<220x4xbf16>
    %c0_2 = arith.constant 0 : index
    %c0_3 = arith.constant 0 : index
    %c0_4 = arith.constant 0 : index
    %9 = vector.load %arg3[%c0_2, %c0_3, %c0_4] : memref<9x4x32xbf16, #tpu.memory_space<vmem>>, vector<1x4x32xbf16>
    %10 = vector.shape_cast %9 : vector<1x4x32xbf16> to vector<4x32xbf16>
    %cst_5 = arith.constant dense<0.000000e+00> : vector<220x32xf32>
    %11 = tpu.matmul %8, %10, %cst_5 {dimension_numbers = #tpu.dot_dimension_numbers<[1], [0], [0], [1], [0, 0, 1, 1], [], []>} : vector<220x4xbf16>, vector<4x32xbf16>, vector<220x32xf32> -> vector<220x32xf32>
    %12 = arith.addf %2, %11 : vector<220x32xf32>
    %c0_i32_6 = arith.constant 0 : i32
    %13 = arith.addi %1, %c0_i32_6 : i32
    %c1_i32 = arith.constant 1 : i32
    %14 = arith.addi %13, %c1_i32 : i32
    %c0_7 = arith.constant 0 : index
    %15 = arith.index_cast %14 : i32 to index
    %c0_8 = arith.constant 0 : index
    %16 = vector.load %arg2[%c0_7, %15, %c0_8] : memref<1x440x4xf32, #tpu.memory_space<vmem>>, vector<1x220x4xf32>
    %17 = vector.shape_cast %16 : vector<1x220x4xf32> to vector<220x4xf32>
    %18 = arith.truncf %17 : vector<220x4xf32> to vector<220x4xbf16>
    %c1 = arith.constant 1 : index
    %c0_9 = arith.constant 0 : index
    %c0_10 = arith.constant 0 : index
    %19 = vector.load %arg3[%c1, %c0_9, %c0_10] : memref<9x4x32xbf16, #tpu.memory_space<vmem>>, vector<1x4x32xbf16>
    %20 = vector.shape_cast %19 : vector<1x4x32xbf16> to vector<4x32xbf16>
    %cst_11 = arith.constant dense<0.000000e+00> : vector<220x32xf32>
    %21 = tpu.matmul %18, %20, %cst_11 {dimension_numbers = #tpu.dot_dimension_numbers<[1], [0], [0], [1], [0, 0, 1, 1], [], []>} : vector<220x4xbf16>, vector<4x32xbf16>, vector<220x32xf32> -> vector<220x32xf32>
    %22 = arith.addf %12, %21 : vector<220x32xf32>
    %c0_i32_12 = arith.constant 0 : i32
    %23 = arith.addi %1, %c0_i32_12 : i32
    %c2_i32 = arith.constant 2 : i32
    %24 = arith.addi %23, %c2_i32 : i32
    %c0_13 = arith.constant 0 : index
    %25 = arith.index_cast %24 : i32 to index
    %c0_14 = arith.constant 0 : index
    %26 = vector.load %arg2[%c0_13, %25, %c0_14] : memref<1x440x4xf32, #tpu.memory_space<vmem>>, vector<1x220x4xf32>
    %27 = vector.shape_cast %26 : vector<1x220x4xf32> to vector<220x4xf32>
    %28 = arith.truncf %27 : vector<220x4xf32> to vector<220x4xbf16>
    %c2 = arith.constant 2 : index
    %c0_15 = arith.constant 0 : index
    %c0_16 = arith.constant 0 : index
    %29 = vector.load %arg3[%c2, %c0_15, %c0_16] : memref<9x4x32xbf16, #tpu.memory_space<vmem>>, vector<1x4x32xbf16>
    %30 = vector.shape_cast %29 : vector<1x4x32xbf16> to vector<4x32xbf16>
    %cst_17 = arith.constant dense<0.000000e+00> : vector<220x32xf32>
    %31 = tpu.matmul %28, %30, %cst_17 {dimension_numbers = #tpu.dot_dimension_numbers<[1], [0], [0], [1], [0, 0, 1, 1], [], []>} : vector<220x4xbf16>, vector<4x32xbf16>, vector<220x32xf32> -> vector<220x32xf32>
    %32 = arith.addf %22, %31 : vector<220x32xf32>
    %c20_i32 = arith.constant 20 : i32
    %33 = arith.addi %1, %c20_i32 : i32
    %c0_i32_18 = arith.constant 0 : i32
    %34 = arith.addi %33, %c0_i32_18 : i32
    %c0_19 = arith.constant 0 : index
    %35 = arith.index_cast %34 : i32 to index
    %c0_20 = arith.constant 0 : index
    %36 = vector.load %arg2[%c0_19, %35, %c0_20] : memref<1x440x4xf32, #tpu.memory_space<vmem>>, vector<1x220x4xf32>
    %37 = vector.shape_cast %36 : vector<1x220x4xf32> to vector<220x4xf32>
    %38 = arith.truncf %37 : vector<220x4xf32> to vector<220x4xbf16>
    %c3 = arith.constant 3 : index
    %c0_21 = arith.constant 0 : index
    %c0_22 = arith.constant 0 : index
    %39 = vector.load %arg3[%c3, %c0_21, %c0_22] : memref<9x4x32xbf16, #tpu.memory_space<vmem>>, vector<1x4x32xbf16>
    %40 = vector.shape_cast %39 : vector<1x4x32xbf16> to vector<4x32xbf16>
    %cst_23 = arith.constant dense<0.000000e+00> : vector<220x32xf32>
    %41 = tpu.matmul %38, %40, %cst_23 {dimension_numbers = #tpu.dot_dimension_numbers<[1], [0], [0], [1], [0, 0, 1, 1], [], []>} : vector<220x4xbf16>, vector<4x32xbf16>, vector<220x32xf32> -> vector<220x32xf32>
    %42 = arith.addf %32, %41 : vector<220x32xf32>
    %c20_i32_24 = arith.constant 20 : i32
    %43 = arith.addi %1, %c20_i32_24 : i32
    %c1_i32_25 = arith.constant 1 : i32
    %44 = arith.addi %43, %c1_i32_25 : i32
    %c0_26 = arith.constant 0 : index
    %45 = arith.index_cast %44 : i32 to index
    %c0_27 = arith.constant 0 : index
    %46 = vector.load %arg2[%c0_26, %45, %c0_27] : memref<1x440x4xf32, #tpu.memory_space<vmem>>, vector<1x220x4xf32>
    %47 = vector.shape_cast %46 : vector<1x220x4xf32> to vector<220x4xf32>
    %48 = arith.truncf %47 : vector<220x4xf32> to vector<220x4xbf16>
    %c4 = arith.constant 4 : index
    %c0_28 = arith.constant 0 : index
    %c0_29 = arith.constant 0 : index
    %49 = vector.load %arg3[%c4, %c0_28, %c0_29] : memref<9x4x32xbf16, #tpu.memory_space<vmem>>, vector<1x4x32xbf16>
    %50 = vector.shape_cast %49 : vector<1x4x32xbf16> to vector<4x32xbf16>
    %cst_30 = arith.constant dense<0.000000e+00> : vector<220x32xf32>
    %51 = tpu.matmul %48, %50, %cst_30 {dimension_numbers = #tpu.dot_dimension_numbers<[1], [0], [0], [1], [0, 0, 1, 1], [], []>} : vector<220x4xbf16>, vector<4x32xbf16>, vector<220x32xf32> -> vector<220x32xf32>
    %52 = arith.addf %42, %51 : vector<220x32xf32>
    %c20_i32_31 = arith.constant 20 : i32
    %53 = arith.addi %1, %c20_i32_31 : i32
    %c2_i32_32 = arith.constant 2 : i32
    %54 = arith.addi %53, %c2_i32_32 : i32
    %c0_33 = arith.constant 0 : index
    %55 = arith.index_cast %54 : i32 to index
    %c0_34 = arith.constant 0 : index
    %56 = vector.load %arg2[%c0_33, %55, %c0_34] : memref<1x440x4xf32, #tpu.memory_space<vmem>>, vector<1x220x4xf32>
    %57 = vector.shape_cast %56 : vector<1x220x4xf32> to vector<220x4xf32>
    %58 = arith.truncf %57 : vector<220x4xf32> to vector<220x4xbf16>
    %c5 = arith.constant 5 : index
    %c0_35 = arith.constant 0 : index
    %c0_36 = arith.constant 0 : index
    %59 = vector.load %arg3[%c5, %c0_35, %c0_36] : memref<9x4x32xbf16, #tpu.memory_space<vmem>>, vector<1x4x32xbf16>
    %60 = vector.shape_cast %59 : vector<1x4x32xbf16> to vector<4x32xbf16>
    %cst_37 = arith.constant dense<0.000000e+00> : vector<220x32xf32>
    %61 = tpu.matmul %58, %60, %cst_37 {dimension_numbers = #tpu.dot_dimension_numbers<[1], [0], [0], [1], [0, 0, 1, 1], [], []>} : vector<220x4xbf16>, vector<4x32xbf16>, vector<220x32xf32> -> vector<220x32xf32>
    %62 = arith.addf %52, %61 : vector<220x32xf32>
    %c40_i32 = arith.constant 40 : i32
    %63 = arith.addi %1, %c40_i32 : i32
    %c0_i32_38 = arith.constant 0 : i32
    %64 = arith.addi %63, %c0_i32_38 : i32
    %c0_39 = arith.constant 0 : index
    %65 = arith.index_cast %64 : i32 to index
    %c0_40 = arith.constant 0 : index
    %66 = vector.load %arg2[%c0_39, %65, %c0_40] : memref<1x440x4xf32, #tpu.memory_space<vmem>>, vector<1x220x4xf32>
    %67 = vector.shape_cast %66 : vector<1x220x4xf32> to vector<220x4xf32>
    %68 = arith.truncf %67 : vector<220x4xf32> to vector<220x4xbf16>
    %c6 = arith.constant 6 : index
    %c0_41 = arith.constant 0 : index
    %c0_42 = arith.constant 0 : index
    %69 = vector.load %arg3[%c6, %c0_41, %c0_42] : memref<9x4x32xbf16, #tpu.memory_space<vmem>>, vector<1x4x32xbf16>
    %70 = vector.shape_cast %69 : vector<1x4x32xbf16> to vector<4x32xbf16>
    %cst_43 = arith.constant dense<0.000000e+00> : vector<220x32xf32>
    %71 = tpu.matmul %68, %70, %cst_43 {dimension_numbers = #tpu.dot_dimension_numbers<[1], [0], [0], [1], [0, 0, 1, 1], [], []>} : vector<220x4xbf16>, vector<4x32xbf16>, vector<220x32xf32> -> vector<220x32xf32>
    %72 = arith.addf %62, %71 : vector<220x32xf32>
    %c40_i32_44 = arith.constant 40 : i32
    %73 = arith.addi %1, %c40_i32_44 : i32
    %c1_i32_45 = arith.constant 1 : i32
    %74 = arith.addi %73, %c1_i32_45 : i32
    %c0_46 = arith.constant 0 : index
    %75 = arith.index_cast %74 : i32 to index
    %c0_47 = arith.constant 0 : index
    %76 = vector.load %arg2[%c0_46, %75, %c0_47] : memref<1x440x4xf32, #tpu.memory_space<vmem>>, vector<1x220x4xf32>
    %77 = vector.shape_cast %76 : vector<1x220x4xf32> to vector<220x4xf32>
    %78 = arith.truncf %77 : vector<220x4xf32> to vector<220x4xbf16>
    %c7 = arith.constant 7 : index
    %c0_48 = arith.constant 0 : index
    %c0_49 = arith.constant 0 : index
    %79 = vector.load %arg3[%c7, %c0_48, %c0_49] : memref<9x4x32xbf16, #tpu.memory_space<vmem>>, vector<1x4x32xbf16>
    %80 = vector.shape_cast %79 : vector<1x4x32xbf16> to vector<4x32xbf16>
    %cst_50 = arith.constant dense<0.000000e+00> : vector<220x32xf32>
    %81 = tpu.matmul %78, %80, %cst_50 {dimension_numbers = #tpu.dot_dimension_numbers<[1], [0], [0], [1], [0, 0, 1, 1], [], []>} : vector<220x4xbf16>, vector<4x32xbf16>, vector<220x32xf32> -> vector<220x32xf32>
    %82 = arith.addf %72, %81 : vector<220x32xf32>
    %c40_i32_51 = arith.constant 40 : i32
    %83 = arith.addi %1, %c40_i32_51 : i32
    %c2_i32_52 = arith.constant 2 : i32
    %84 = arith.addi %83, %c2_i32_52 : i32
    %c0_53 = arith.constant 0 : index
    %85 = arith.index_cast %84 : i32 to index
    %c0_54 = arith.constant 0 : index
    %86 = vector.load %arg2[%c0_53, %85, %c0_54] : memref<1x440x4xf32, #tpu.memory_space<vmem>>, vector<1x220x4xf32>
    %87 = vector.shape_cast %86 : vector<1x220x4xf32> to vector<220x4xf32>
    %88 = arith.truncf %87 : vector<220x4xf32> to vector<220x4xbf16>
    %c8 = arith.constant 8 : index
    %c0_55 = arith.constant 0 : index
    %c0_56 = arith.constant 0 : index
    %89 = vector.load %arg3[%c8, %c0_55, %c0_56] : memref<9x4x32xbf16, #tpu.memory_space<vmem>>, vector<1x4x32xbf16>
    %90 = vector.shape_cast %89 : vector<1x4x32xbf16> to vector<4x32xbf16>
    %cst_57 = arith.constant dense<0.000000e+00> : vector<220x32xf32>
    %91 = tpu.matmul %88, %90, %cst_57 {dimension_numbers = #tpu.dot_dimension_numbers<[1], [0], [0], [1], [0, 0, 1, 1], [], []>} : vector<220x4xbf16>, vector<4x32xbf16>, vector<220x32xf32> -> vector<220x32xf32>
    %92 = arith.addf %82, %91 : vector<220x32xf32>
    %c0_58 = arith.constant 0 : index
    %c0_59 = arith.constant 0 : index
    %93 = vector.load %arg4[%c0_58, %c0_59] : memref<1x32xf32, #tpu.memory_space<vmem>>, vector<1x32xf32>
    %94 = vector.broadcast %93 : vector<1x32xf32> to vector<220x32xf32>
    %95 = arith.addf %92, %94 : vector<220x32xf32>
    %cst_60 = arith.constant 0.000000e+00 : f32
    %96 = vector.broadcast %cst_60 : f32 to vector<220x32xf32>
    %97 = arith.maximumf %95, %96 : vector<220x32xf32>
    %98 = arith.index_cast %1 : i32 to index
    %c0_61 = arith.constant 0 : index
    %99 = vector.load %arg7[%98, %c0_61] : memref<440x1xbf16, #tpu.memory_space<vmem>>, vector<220x1xbf16>
    %100 = arith.extf %99 : vector<220x1xbf16> to vector<220x1xf32>
    %101 = vector.broadcast %100 : vector<220x1xf32> to vector<220x32xf32>
    %102 = arith.mulf %97, %101 : vector<220x32xf32>
    %c0_62 = arith.constant 0 : index
    %c0_63 = arith.constant 0 : index
    %103 = vector.load %arg9[%c0_62, %c0_63] : memref<220x32xf32, #tpu.memory_space<vmem>>, vector<220x32xf32>
    tpu.vector_store %arg9[%c0_62, %c0_63], %102 {strides = array<i32>} : memref<220x32xf32, #tpu.memory_space<vmem>>, vector<220x32xf32>,
    %cst_64 = arith.constant 0.000000e+00 : f32
    %104 = vector.broadcast %cst_64 : f32 to vector<160x2xf32>
    %c0_65 = arith.constant 0 : index
    %c0_66 = arith.constant 0 : index
    %105 = vector.load %arg9[%c0_65, %c0_66] : memref<220x32xf32, #tpu.memory_space<vmem>>, vector<160x32xf32>
    %106 = arith.truncf %105 : vector<160x32xf32> to vector<160x32xbf16>
    %c0_67 = arith.constant 0 : index
    %c0_68 = arith.constant 0 : index
    %c0_69 = arith.constant 0 : index
    %107 = vector.load %arg5[%c0_67, %c0_68, %c0_69] : memref<9x32x2xbf16, #tpu.memory_space<vmem>>, vector<1x32x2xbf16>
    %108 = vector.shape_cast %107 : vector<1x32x2xbf16> to vector<32x2xbf16>
    %cst_70 = arith.constant dense<0.000000e+00> : vector<160x2xf32>
    %109 = tpu.matmul %106, %108, %cst_70 {dimension_numbers = #tpu.dot_dimension_numbers<[1], [0], [0], [1], [0, 0, 1, 1], [], []>} : vector<160x32xbf16>, vector<32x2xbf16>, vector<160x2xf32> -> vector<160x2xf32>
    %110 = arith.addf %104, %109 : vector<160x2xf32>
    %c1_71 = arith.constant 1 : index
    %c0_72 = arith.constant 0 : index
    %111 = vector.load %arg9[%c1_71, %c0_72] : memref<220x32xf32, #tpu.memory_space<vmem>>, vector<160x32xf32>
    %112 = arith.truncf %111 : vector<160x32xf32> to vector<160x32xbf16>
    %c1_73 = arith.constant 1 : index
    %c0_74 = arith.constant 0 : index
    %c0_75 = arith.constant 0 : index
    %113 = vector.load %arg5[%c1_73, %c0_74, %c0_75] : memref<9x32x2xbf16, #tpu.memory_space<vmem>>, vector<1x32x2xbf16>
    %114 = vector.shape_cast %113 : vector<1x32x2xbf16> to vector<32x2xbf16>
    %cst_76 = arith.constant dense<0.000000e+00> : vector<160x2xf32>
    %115 = tpu.matmul %112, %114, %cst_76 {dimension_numbers = #tpu.dot_dimension_numbers<[1], [0], [0], [1], [0, 0, 1, 1], [], []>} : vector<160x32xbf16>, vector<32x2xbf16>, vector<160x2xf32> -> vector<160x2xf32>
    %116 = arith.addf %110, %115 : vector<160x2xf32>
    %c2_77 = arith.constant 2 : index
    %c0_78 = arith.constant 0 : index
    %117 = vector.load %arg9[%c2_77, %c0_78] : memref<220x32xf32, #tpu.memory_space<vmem>>, vector<160x32xf32>
    %118 = arith.truncf %117 : vector<160x32xf32> to vector<160x32xbf16>
    %c2_79 = arith.constant 2 : index
    %c0_80 = arith.constant 0 : index
    %c0_81 = arith.constant 0 : index
    %119 = vector.load %arg5[%c2_79, %c0_80, %c0_81] : memref<9x32x2xbf16, #tpu.memory_space<vmem>>, vector<1x32x2xbf16>
    %120 = vector.shape_cast %119 : vector<1x32x2xbf16> to vector<32x2xbf16>
    %cst_82 = arith.constant dense<0.000000e+00> : vector<160x2xf32>
    %121 = tpu.matmul %118, %120, %cst_82 {dimension_numbers = #tpu.dot_dimension_numbers<[1], [0], [0], [1], [0, 0, 1, 1], [], []>} : vector<160x32xbf16>, vector<32x2xbf16>, vector<160x2xf32> -> vector<160x2xf32>
    %122 = arith.addf %116, %121 : vector<160x2xf32>
    %c20 = arith.constant 20 : index
    %c0_83 = arith.constant 0 : index
    %123 = vector.load %arg9[%c20, %c0_83] : memref<220x32xf32, #tpu.memory_space<vmem>>, vector<160x32xf32>
    %124 = arith.truncf %123 : vector<160x32xf32> to vector<160x32xbf16>
    %c3_84 = arith.constant 3 : index
    %c0_85 = arith.constant 0 : index
    %c0_86 = arith.constant 0 : index
    %125 = vector.load %arg5[%c3_84, %c0_85, %c0_86] : memref<9x32x2xbf16, #tpu.memory_space<vmem>>, vector<1x32x2xbf16>
    %126 = vector.shape_cast %125 : vector<1x32x2xbf16> to vector<32x2xbf16>
    %cst_87 = arith.constant dense<0.000000e+00> : vector<160x2xf32>
    %127 = tpu.matmul %124, %126, %cst_87 {dimension_numbers = #tpu.dot_dimension_numbers<[1], [0], [0], [1], [0, 0, 1, 1], [], []>} : vector<160x32xbf16>, vector<32x2xbf16>, vector<160x2xf32> -> vector<160x2xf32>
    %128 = arith.addf %122, %127 : vector<160x2xf32>
    %c21 = arith.constant 21 : index
    %c0_88 = arith.constant 0 : index
    %129 = vector.load %arg9[%c21, %c0_88] : memref<220x32xf32, #tpu.memory_space<vmem>>, vector<160x32xf32>
    %130 = arith.truncf %129 : vector<160x32xf32> to vector<160x32xbf16>
    %c4_89 = arith.constant 4 : index
    %c0_90 = arith.constant 0 : index
    %c0_91 = arith.constant 0 : index
    %131 = vector.load %arg5[%c4_89, %c0_90, %c0_91] : memref<9x32x2xbf16, #tpu.memory_space<vmem>>, vector<1x32x2xbf16>
    %132 = vector.shape_cast %131 : vector<1x32x2xbf16> to vector<32x2xbf16>
    %cst_92 = arith.constant dense<0.000000e+00> : vector<160x2xf32>
    %133 = tpu.matmul %130, %132, %cst_92 {dimension_numbers = #tpu.dot_dimension_numbers<[1], [0], [0], [1], [0, 0, 1, 1], [], []>} : vector<160x32xbf16>, vector<32x2xbf16>, vector<160x2xf32> -> vector<160x2xf32>
    %134 = arith.addf %128, %133 : vector<160x2xf32>
    %c22 = arith.constant 22 : index
    %c0_93 = arith.constant 0 : index
    %135 = vector.load %arg9[%c22, %c0_93] : memref<220x32xf32, #tpu.memory_space<vmem>>, vector<160x32xf32>
    %136 = arith.truncf %135 : vector<160x32xf32> to vector<160x32xbf16>
    %c5_94 = arith.constant 5 : index
    %c0_95 = arith.constant 0 : index
    %c0_96 = arith.constant 0 : index
    %137 = vector.load %arg5[%c5_94, %c0_95, %c0_96] : memref<9x32x2xbf16, #tpu.memory_space<vmem>>, vector<1x32x2xbf16>
    %138 = vector.shape_cast %137 : vector<1x32x2xbf16> to vector<32x2xbf16>
    %cst_97 = arith.constant dense<0.000000e+00> : vector<160x2xf32>
    %139 = tpu.matmul %136, %138, %cst_97 {dimension_numbers = #tpu.dot_dimension_numbers<[1], [0], [0], [1], [0, 0, 1, 1], [], []>} : vector<160x32xbf16>, vector<32x2xbf16>, vector<160x2xf32> -> vector<160x2xf32>
    %140 = arith.addf %134, %139 : vector<160x2xf32>
    %c40 = arith.constant 40 : index
    %c0_98 = arith.constant 0 : index
    %141 = vector.load %arg9[%c40, %c0_98] : memref<220x32xf32, #tpu.memory_space<vmem>>, vector<160x32xf32>
    %142 = arith.truncf %141 : vector<160x32xf32> to vector<160x32xbf16>
    %c6_99 = arith.constant 6 : index
    %c0_100 = arith.constant 0 : index
    %c0_101 = arith.constant 0 : index
    %143 = vector.load %arg5[%c6_99, %c0_100, %c0_101] : memref<9x32x2xbf16, #tpu.memory_space<vmem>>, vector<1x32x2xbf16>
    %144 = vector.shape_cast %143 : vector<1x32x2xbf16> to vector<32x2xbf16>
    %cst_102 = arith.constant dense<0.000000e+00> : vector<160x2xf32>
    %145 = tpu.matmul %142, %144, %cst_102 {dimension_numbers = #tpu.dot_dimension_numbers<[1], [0], [0], [1], [0, 0, 1, 1], [], []>} : vector<160x32xbf16>, vector<32x2xbf16>, vector<160x2xf32> -> vector<160x2xf32>
    %146 = arith.addf %140, %145 : vector<160x2xf32>
    %c41 = arith.constant 41 : index
    %c0_103 = arith.constant 0 : index
    %147 = vector.load %arg9[%c41, %c0_103] : memref<220x32xf32, #tpu.memory_space<vmem>>, vector<160x32xf32>
    %148 = arith.truncf %147 : vector<160x32xf32> to vector<160x32xbf16>
    %c7_104 = arith.constant 7 : index
    %c0_105 = arith.constant 0 : index
    %c0_106 = arith.constant 0 : index
    %149 = vector.load %arg5[%c7_104, %c0_105, %c0_106] : memref<9x32x2xbf16, #tpu.memory_space<vmem>>, vector<1x32x2xbf16>
    %150 = vector.shape_cast %149 : vector<1x32x2xbf16> to vector<32x2xbf16>
    %cst_107 = arith.constant dense<0.000000e+00> : vector<160x2xf32>
    %151 = tpu.matmul %148, %150, %cst_107 {dimension_numbers = #tpu.dot_dimension_numbers<[1], [0], [0], [1], [0, 0, 1, 1], [], []>} : vector<160x32xbf16>, vector<32x2xbf16>, vector<160x2xf32> -> vector<160x2xf32>
    %152 = arith.addf %146, %151 : vector<160x2xf32>
    %c42 = arith.constant 42 : index
    %c0_108 = arith.constant 0 : index
    %153 = vector.load %arg9[%c42, %c0_108] : memref<220x32xf32, #tpu.memory_space<vmem>>, vector<160x32xf32>
    %154 = arith.truncf %153 : vector<160x32xf32> to vector<160x32xbf16>
    %c8_109 = arith.constant 8 : index
    %c0_110 = arith.constant 0 : index
    %c0_111 = arith.constant 0 : index
    %155 = vector.load %arg5[%c8_109, %c0_110, %c0_111] : memref<9x32x2xbf16, #tpu.memory_space<vmem>>, vector<1x32x2xbf16>
    %156 = vector.shape_cast %155 : vector<1x32x2xbf16> to vector<32x2xbf16>
    %cst_112 = arith.constant dense<0.000000e+00> : vector<160x2xf32>
    %157 = tpu.matmul %154, %156, %cst_112 {dimension_numbers = #tpu.dot_dimension_numbers<[1], [0], [0], [1], [0, 0, 1, 1], [], []>} : vector<160x32xbf16>, vector<32x2xbf16>, vector<160x2xf32> -> vector<160x2xf32>
    %158 = arith.addf %152, %157 : vector<160x2xf32>
    %c0_113 = arith.constant 0 : index
    %c0_114 = arith.constant 0 : index
    %159 = vector.load %arg6[%c0_113, %c0_114] : memref<1x2xf32, #tpu.memory_space<vmem>>, vector<1x2xf32>
    %160 = vector.broadcast %159 : vector<1x2xf32> to vector<160x2xf32>
    %161 = arith.addf %158, %160 : vector<160x2xf32>
    %c0_115 = arith.constant 0 : index
    %c0_116 = arith.constant 0 : index
    %c0_117 = arith.constant 0 : index
    %162 = vector.load %arg8[%c0_115, %c0_116, %c0_117] : memref<1x160x2xf32, #tpu.memory_space<vmem>>, vector<1x160x2xf32>
    %163 = vector.shape_cast %162 : vector<1x160x2xf32> to vector<160x2xf32>
    %164 = vector.shape_cast %161 : vector<160x2xf32> to vector<1x160x2xf32>
    tpu.vector_store %arg8[%c0_115, %c0_116, %c0_117], %164 {strides = array<i32>} : memref<1x160x2xf32, #tpu.memory_space<vmem>>, vector<1x160x2xf32>,
    return
  }
  func.func @transform_0(%arg0: i32, %arg1: i32) -> (i32, i32, i32) {
    %c0_i32 = arith.constant 0 : i32
    %c0_i32_0 = arith.constant 0 : i32
    %c0_i32_1 = arith.constant 0 : i32
    return %arg0, %c0_i32, %c0_i32_0 : i32, i32, i32
  }
  func.func @transform_1(%arg0: i32, %arg1: i32) -> (i32, i32, i32) {
    %c0_i32 = arith.constant 0 : i32
    %c0_i32_0 = arith.constant 0 : i32
    %c0_i32_1 = arith.constant 0 : i32
    %c0_i32_2 = arith.constant 0 : i32
    return %c0_i32, %c0_i32_0, %c0_i32_1 : i32, i32, i32
  }
  func.func @transform_2(%arg0: i32, %arg1: i32) -> (i32, i32) {
    %c0_i32 = arith.constant 0 : i32
    %c0_i32_0 = arith.constant 0 : i32
    %c0_i32_1 = arith.constant 0 : i32
    return %c0_i32, %c0_i32_0 : i32, i32
  }
  func.func @transform_3(%arg0: i32, %arg1: i32) -> (i32, i32, i32) {
    %c0_i32 = arith.constant 0 : i32
    %c0_i32_0 = arith.constant 0 : i32
    %c0_i32_1 = arith.constant 0 : i32
    %c0_i32_2 = arith.constant 0 : i32
    return %c0_i32, %c0_i32_0, %c0_i32_1 : i32, i32, i32
  }
  func.func @transform_4(%arg0: i32, %arg1: i32) -> (i32, i32) {
    %c0_i32 = arith.constant 0 : i32
    %c0_i32_0 = arith.constant 0 : i32
    %c0_i32_1 = arith.constant 0 : i32
    return %c0_i32, %c0_i32_0 : i32, i32
  }
  func.func @transform_5(%arg0: i32, %arg1: i32) -> (i32, i32) {
    %c0_i32 = arith.constant 0 : i32
    %c0_i32_0 = arith.constant 0 : i32
    %c0_i32_1 = arith.constant 0 : i32
    return %c0_i32, %c0_i32_0 : i32, i32
  }
  func.func @transform_6(%arg0: i32, %arg1: i32) -> (i32, i32, i32) {
    %c0_i32 = arith.constant 0 : i32
    %c0_i32_0 = arith.constant 0 : i32
    return %arg0, %arg1, %c0_i32 : i32, i32, i32
  }
}

</mosaic_0001>

<bundles_post_ra>
// kernel: tpu_custom_call.1
= control target key start
LH: loop header
LB: loop body
LE: loop exit
PB: predicated region body
PF: predicated region fallthrough
CT: control target
= control target key end

     0   :  { %s6830_s21 = smov 0   ;;  %s6832_s22 = smov 0   ;;  %s8131_s0 = inlined_call_operand.vmem [shape: f32[2,440,4], index: 0, kind: input, shape index: {}]   ;;  %s8132_s1 = inlined_call_operand.vmem [shape: bf16[9,4,32], index: 1, kind: input, shape index: {}]   ;;  %s8133_s2 = inlined_call_operand.vmem [shape: f32[1,32], index: 2, kind: input, shape index: {}]   ;;  %s8134_s3 = inlined_call_operand.vmem [shape: bf16[9,32,2], index: 3, kind: input, shape index: {}]   ;;  %s8135_s4 = inlined_call_operand.vmem [shape: f32[1,2], index: 4, kind: input, shape index: {}]   ;;  %s8136_s5 = inlined_call_operand.vmem [shape: bf16[440,1], index: 5, kind: input, shape index: {}]   ;;  %s8137_s6 = inlined_call_operand.vmem [shape: f32[2,320,2], index: 6, kind: output, shape index: {}]  }
   0x1   :  { %s6834_s23 = smov 0   ;;  %s6836_s24 = smov 0  }
   0x2   :  { %s6838_s25 = smov 0  }
   0x3 LB: > { %s25_s26 = sadd.s32 1, %s6784_s23  ;;  %s28_s27 = sadd.s32 1, %s6788_s24  ;;  %s6792_s25 = sphi %s6838_s25, %s16_s25   ;;  %s6788_s24 = sphi %s6836_s24, %s8194_s24   ;;  %s6784_s23 = sphi %s6834_s23, %s8193_s23   ;;  %s6780_s22 = sphi %s6832_s22, %s8192_s22   ;;  %s6776_s21 = sphi %s6830_s21, %s8191_s21  }
   0x4   : > { %p26_p0 = scmp.ge.s32.totalorder %s25_s26, 2  ;;  %p4931_p1 = scmp.ge.s32.totalorder %s6792_s25, 1 }
   0x5   : > { %p226_p2 = scmp.lt.s32.totalorder %s6792_s25, 5 }
   0x6   : > { %s8196_s26 = smov (%p26_p0, %s25_s26), 0  ;;  %s8198_s27 = smov (!%p26_p0, %s28_s27), %s6788_s24 }
   0x7   : > { %p227_p3 = pnand %p4931_p1, %p226_p2  ;;  %p30_p4 = scmp.ge.s32.totalorder %s8198_s27, 2 }
   0x9   : > { %s8200_s27 = smov (%p30_p4, %s8198_s27), 0  ;;  %230 = sbr.rel (%p227_p3) target bundleno = 1212 (0x4bc), region = 44 }
  0x10   : > { %v6865_v0 = vld [vmem:[%s8132_s1] sm:$0x3]  ;;  %vm410_vm0 = vcmask 1041408   ;;  %p260_p5 = scmp.lt.s32.totalorder %s6780_s22, 1  ;;  %v5019_v2 = vld [vmem:[%s8132_s1 + $0x4] sm:$0x3] }
  0x11   : > { %6617 = vmatprep.subr.msk.bf16.mxu0 %vm410_vm0, %v6865_v0  ;;  %v6871_v1 = vsel %vm410_vm0, %v6865_v0, 0  ;;  %s276_s8 = smul.u32 160, %s6776_s21  ;;  %vm367_vm1 = vcmask 31744   ;;  %v838_v11 = vsel %vm410_vm0, %v5019_v2, 0  ;;  %v5062_v13 = vld [vmem:[%s8132_s1 + $0x6] sm:$0x3] }
  0x12   : > { %5775 = vmatpush3.bf16.msra.mxu0 %v6871_v1  ;;  %s8202_s22 = smov (!%p260_p5, %s6780_s22), 1  ;;  %v1102_v44 = vsel %vm410_vm0, %v5062_v13, 0  ;;  %v5105_v45 = vld [vmem:[%s8132_s1 + $0x8] sm:$0x3]  ;;  %vm2888_vm2 = vcmask 261120   ;;  %s265_s20 = smul.u32 20, %s6776_s21 }
  0x13   : > { %6619 = vmatprep.subr.msk.bf16.mxu0 %vm410_vm0, %v5019_v2  ;;  %s6626_s9 = smul.u32 440, %s8202_s22  ;;  %vm4794_vm3 = vcmask 15360  }
  0x14   : > { %p268_p6 = scmp.lt.s32.totalorder %s265_s20, 39  ;;  %s6627_s28 = smul.u32 40, %s8202_s22 }
  0x15   : > { %s264_s12 = scalar_lea.vmem %s8131_s0, %s6626_s9 }
  0x16   : > { %s6887_s13 = scalar_lea.vmem %s264_s12, %s276_s8  ;;  %s2660_s12 = sshra.s32 %s276_s8, 3 }
  0x17   : > { %v278_v3 = vld [vmem:[%s6887_s13] sm:$0xff]  ;;  %v279_v4 = vld [vmem:[%s6887_s13 + $0x8] sm:$0xff]  ;;  %v280_v5 = vld [vmem:[%s6887_s13 + $0x10] sm:$0xff]  ;;  %s5293_s14 = sshll.u32 %s2660_s12, 2  ;;  %s8204_s20 = smov (!%p268_p6, %s265_s20), 39 }
  0x18   : > { %v306_v6 = vpack.c.bf16 %v279_v4, %v278_v3  ;;  %v281_v7 = vld [vmem:[%s6887_s13 + $0x18] sm:$0xff]  ;;  %v282_v8 = vld [vmem:[%s6887_s13 + $0x20] sm:$0xff]  ;;  %v6895_v9 = vld [vmem:[%s6887_s13 + $0x28] sm:$0xff]  ;;  %s7424_s17 = scalar_lea.vmem %s8136_s5, %s5293_s14  ;;  %s271_s29 = sadd.s32 %s6627_s28, %s8204_s20 }
  0x19   : > { %v307_v10 = vpack.c.bf16 %v281_v7, %v280_v5  ;;  %v308_v12 = vpack.c.bf16 %v6895_v9, %v282_v8  ;;  %v6906_v14 = vld [vmem:[%s6887_s13 + $0x30] sm:$0xff]  ;;  %v6909_v15 = vld [vmem:[%s6887_s13 + $0x38] sm:$0xff]  ;;  %v6912_v16 = vld [vmem:[%s6887_s13 + $0x40] sm:$0xff]  ;;  %s4933_s30 = sshll.u32 %s271_s29, 3 }
  0x1a   : > { %5776 = vmatprep.mubr.msk.bf16.mxu0 %vm367_vm1, %v306_v6  ;;  %v6915_v17 = vld [vmem:[%s6887_s13 + $0x48] sm:$0xff]  ;;  %v309_v18 = vpack.c.bf16 %v6909_v15, %v6906_v14  ;;  %v6925_v20 = vld [vmem:[%s6887_s13 + $0x50] sm:$0xff]  ;;  %v6928_v21 = vld [vmem:[%s6887_s13 + $0x58] sm:$0xff]  ;;  %s8074_s12 = scalar_lea.vmem %s8137_s6, %s4933_s30 }
  0x1b   : > { %5777 = vmatmul.mubr.msk.bf16.vlgmr.msra.gmra.mrb[0].mxu0 %vm367_vm1, %v307_v10  ;;  %v310_v19 = vpack.c.bf16 %v6915_v17, %v6912_v16  ;;  %v6931_v22 = vld [vmem:[%s6887_s13 + $0x60] sm:$0xff]  ;;  %v6934_v23 = vld [vmem:[%s6887_s13 + $0x68] sm:$0xff]  ;;  %v311_v24 = vpack.c.bf16 %v6928_v21, %v6925_v20  ;;  %v6943_v26 = vld [vmem:[%s6887_s13 + $0x70] sm:$0xff] }
  0x1c   : > { %5805 = vmatpush3.bf16.msra.mxu0 %v838_v11  ;;  %5780 = vmatprep.mubr.msk.bf16.mxu0 %vm367_vm1, %v308_v12  ;;  %v312_v25 = vpack.c.bf16 %v6934_v23, %v6931_v22  ;;  %v6946_v27 = vld [vmem:[%s6887_s13 + $0x78] sm:$0xff]  ;;  %v6949_v28 = vld [vmem:[%s6887_s13 + $0x80] sm:$0xff]  ;;  %v6952_v29 = vld [vmem:[%s6887_s13 + $0x88] sm:$0xff] }
  0x1d   : > { %6620 = vmatprep.subr.msk.bf16.mxu0 %vm410_vm0, %v5062_v13  ;;  %v313_v30 = vpack.c.bf16 %v6946_v27, %v6943_v26  ;;  %v314_v31 = vpack.c.bf16 %v6952_v29, %v6949_v28  ;;  %v6961_v32 = vld [vmem:[%s6887_s13 + $0x90] sm:$0xff]  ;;  %v6964_v33 = vld [vmem:[%s6887_s13 + $0x98] sm:$0xff]  ;;  %v4991_v34 = vld [vmem:[%s6887_s13 + $0x2] sm:$0xff] }
  0x1e   : > { %v4992_v35 = vld [vmem:[%s6887_s13 + $0xa] sm:$0xff]  ;;  %v315_v36 = vpack.c.bf16 %v6964_v33, %v6961_v32  ;;  %v4993_v38 = vld [vmem:[%s6887_s13 + $0x12] sm:$0xff]  ;;  %v4994_v39 = vld [vmem:[%s6887_s13 + $0x1a] sm:$0xff] }
  0x1f   : > { %v779_v37 = vpack.c.bf16 %v4992_v35, %v4991_v34  ;;  %v4995_v40 = vld [vmem:[%s6887_s13 + $0x22] sm:$0xff]  ;;  %v6976_v41 = vld [vmem:[%s6887_s13 + $0x2a] sm:$0xff]  ;;  %v780_v42 = vpack.c.bf16 %v4994_v39, %v4993_v38  ;;  %v6986_v46 = vld [vmem:[%s6887_s13 + $0x32] sm:$0xff] }
  0x20   : > { %v781_v43 = vpack.c.bf16 %v6976_v41, %v4995_v40  ;;  %v6989_v47 = vld [vmem:[%s6887_s13 + $0x3a] sm:$0xff]  ;;  %v6992_v48 = vld [vmem:[%s6887_s13 + $0x42] sm:$0xff]  ;;  %v6995_v49 = vld [vmem:[%s6887_s13 + $0x4a] sm:$0xff] }
  0x21   : > { %v782_v50 = vpack.c.bf16 %v6989_v47, %v6986_v46  ;;  %v783_v51 = vpack.c.bf16 %v6995_v49, %v6992_v48  ;;  %v7005_v52 = vld [vmem:[%s6887_s13 + $0x52] sm:$0xff]  ;;  %v7008_v53 = vld [vmem:[%s6887_s13 + $0x5a] sm:$0xff]  ;;  %v7011_v54 = vld [vmem:[%s6887_s13 + $0x62] sm:$0xff] }
  0x22   : > { %v7014_v55 = vld [vmem:[%s6887_s13 + $0x6a] sm:$0xff]  ;;  %v784_v56 = vpack.c.bf16 %v7008_v53, %v7005_v52  ;;  %v7023_v58 = vld [vmem:[%s6887_s13 + $0x72] sm:$0xff]  ;;  %v7026_v59 = vld [vmem:[%s6887_s13 + $0x7a] sm:$0xff] }
  0x23   : > { %5781 = vmatmul.mubr.msk.bf16.gmra.mrb[4].mxu0 %vm367_vm1, %v309_v18  ;;  %v785_v57 = vpack.c.bf16 %v7014_v55, %v7011_v54  ;;  %v7029_v60 = vld [vmem:[%s6887_s13 + $0x82] sm:$0xff]  ;;  %v7032_v61 = vld [vmem:[%s6887_s13 + $0x8a] sm:$0xff]  ;;  %v786_v62 = vpack.c.bf16 %v7026_v59, %v7023_v58  ;;  %v7041_v2 = vld [vmem:[%s6887_s13 + $0x92] sm:$0xff] }
  0x24   : > { %5784 = vmatprep.mubr.msk.bf16.mxu0 %vm367_vm1, %v310_v19  ;;  %v787_v63 = vpack.c.bf16 %v7032_v61, %v7029_v60  ;;  %v7044_v3 = vld [vmem:[%s6887_s13 + $0x9a] sm:$0xff]  ;;  %v7047_v4 = vld [vmem:[%s6887_s13 + $0xa2] sm:$0xff]  ;;  %v7050_v5 = vld [vmem:[%s6887_s13 + $0xaa] sm:$0xff] }
  0x25   : > { %8146 = vst [vmem:[#allocation3_spill] sm:$0xff] %v7044_v3  ;;  %8147 = vst [vmem:[#allocation4_spill] sm:$0xff] %v7047_v4  ;;  %v788_v6 = vpack.c.bf16 %v7044_v3, %v7041_v2  ;;  %v789_v7 = vpack.c.bf16 %v7050_v5, %v7047_v4  ;;  %v7059_v8 = vld [vmem:[%s6887_s13 + $0xb2] sm:$0xff]  ;;  %v7062_v10 = vld [vmem:[%s6887_s13 + $0xba] sm:$0xff] }
  0x26   : > { %8148 = vst [vmem:[#allocation5_spill] sm:$0xff] %v7050_v5  ;;  %8149 = vst [vmem:[#allocation6_spill] sm:$0xff] %v7059_v8  ;;  %v7065_v11 = vld [vmem:[%s6887_s13 + $0xc2] sm:$0xff]  ;;  %v7068_v12 = vld [vmem:[%s6887_s13 + $0xca] sm:$0xff]  ;;  %v790_v13 = vpack.c.bf16 %v7062_v10, %v7059_v8 }
  0x27   : > { %8150 = vst [vmem:[#allocation7_spill] sm:$0xff] %v7062_v10  ;;  %8151 = vst [vmem:[#allocation8_spill] sm:$0xff] %v7065_v11  ;;  %v791_v18 = vpack.c.bf16 %v7068_v12, %v7065_v11  ;;  %v7077_v19 = vld [vmem:[%s6887_s13 + $0xd2] sm:$0xff]  ;;  %v5036_v35 = vld [vmem:[%s6887_s13 + $0x24] sm:$0xff] }
  0x28   : > { %8152 = vst [vmem:[#allocation9_spill] sm:$0xff] %v7068_v12  ;;  %8153 = vst [vmem:[#allocation10_spill] sm:$0xff] %v7077_v19  ;;  %v5039_v38 = vld [vmem:[%s6887_s13 + $0x3c] sm:$0xff]  ;;  %v7262_v10 = vld [vmem:[%s6887_s13 + $0x91] sm:$0xff] }
  0x29   : > { %v4937_v12 = vld [vmem:[%s6887_s13 + $0x19] sm:$0xff]  ;;  %v7311_v8 = vld [vmem:[%s6887_s13 + $0xc9] sm:$0xff]  ;;  %v7314_v5 = vld [vmem:[%s6887_s13 + $0xd1] sm:$0xff] }
  0x2a   : > { %v5140_v4 = vld [vmem:[%s6887_s13 + $0xb6] sm:$0xff]  ;;  %v5141_v3 = vld [vmem:[%s6887_s13 + $0xbe] sm:$0xff] }
  0x2b   : > { %5785 = vmatmul.mubr.msk.bf16.gmra.mrb[8].mxu0 %vm367_vm1, %v311_v24  ;;  %v5018_v24 = vld [vmem:[%s6887_s13 + $0xda] sm:$0xf] }
  0x2c   : > { %5788 = vmatprep.mubr.msk.bf16.mxu0 %vm367_vm1, %v312_v25  ;;  %v5034_v25 = vld [vmem:[%s6887_s13 + $0x14] sm:$0xff] }
  0x33   : > { %5789 = vmatmul.mubr.msk.bf16.gmra.mrb[12].mxu0 %vm367_vm1, %v313_v30  ;;  %v5035_v30 = vld [vmem:[%s6887_s13 + $0x1c] sm:$0xff] }
  0x34   : > { %5792 = vmatprep.mubr.msk.bf16.mxu0 %vm367_vm1, %v314_v31  ;;  %v792_v31 = vpack.c.bf16 %v5018_v24, %v7077_v19  ;;  %v1043_v34 = vpack.c.bf16 %v5035_v30, %v5034_v25  ;;  %v5048_v24 = vld [vmem:[%s6887_s13 + $0x84] sm:$0xff]  ;;  %v5049_v25 = vld [vmem:[%s6887_s13 + $0x8c] sm:$0xff]  ;;  %v5050_v30 = vld [vmem:[%s6887_s13 + $0x94] sm:$0xff] }
  0x35   : > { %v4936_v19 = vld [vmem:[%s6887_s13 + $0x11] sm:$0xff] }
  0x36   : > { %v352_v11 = vpack.c.bf16 %v4937_v12, %v4936_v19 }
  0x3b   : > { %5793 = vmatmul.mubr.msk.bf16.gmra.mrb[16].mxu0 %vm367_vm1, %v315_v36  ;;  %v5037_v36 = vld [vmem:[%s6887_s13 + $0x2c] sm:$0xff] }
  0x3c   : > { %5806 = vmatprep.mubr.msk.bf16.mxu0 %vm367_vm1, %v779_v37  ;;  %v5038_v37 = vld [vmem:[%s6887_s13 + $0x34] sm:$0xff]  ;;  %v1044_v39 = vpack.c.bf16 %v5037_v36, %v5036_v35  ;;  %v5052_v36 = vld [vmem:[%s6887_s13 + $0xa4] sm:$0xff] }
  0x3d   : > { %v1045_v40 = vpack.c.bf16 %v5039_v38, %v5038_v37  ;;  %v5053_v37 = vld [vmem:[%s6887_s13 + $0xac] sm:$0xff]  ;;  %v5054_v38 = vld [vmem:[%s6887_s13 + $0xb4] sm:$0xff] }
  0x43   : > { %5807 = vmatmul.mubr.msk.bf16.vlgmr.msra.gmra.mrb[0].mxu0 %vm367_vm1, %v780_v42  ;;  %v1366_v42 = vsel %vm410_vm0, %v5105_v45, 0 }
  0x44   : > { %5835 = vmatpush3.bf16.msra.mxu0 %v1102_v44  ;;  %5810 = vmatprep.mubr.msk.bf16.mxu0 %vm367_vm1, %v781_v43  ;;  %v5148_v43 = vld [vmem:[%s8132_s1 + $0xa] sm:$0x3] }
  0x45   : > { %6621 = vmatprep.subr.msk.bf16.mxu0 %vm410_vm0, %v5105_v45  ;;  %v5040_v44 = vld [vmem:[%s6887_s13 + $0x44] sm:$0xff] }
  0x4b   : > { %5811 = vmatmul.mubr.msk.bf16.gmra.mrb[4].mxu0 %vm367_vm1, %v782_v50  ;;  %v5041_v50 = vld [vmem:[%s6887_s13 + $0x4c] sm:$0xff] }
  0x4c   : > { %5814 = vmatprep.mubr.msk.bf16.mxu0 %vm367_vm1, %v783_v51  ;;  %v5042_v51 = vld [vmem:[%s6887_s13 + $0x54] sm:$0xff]  ;;  %v1046_v45 = vpack.c.bf16 %v5041_v50, %v5040_v44  ;;  %v5056_v44 = vld [vmem:[%s6887_s13 + $0xc4] sm:$0xff]  ;;  %v5057_v50 = vld [vmem:[%s6887_s13 + $0xcc] sm:$0xff] }
  0x53   : > { %5815 = vmatmul.mubr.msk.bf16.gmra.mrb[8].mxu0 %vm367_vm1, %v784_v56  ;;  %v5043_v56 = vld [vmem:[%s6887_s13 + $0x5c] sm:$0xff] }
  0x54   : > { %5818 = vmatprep.mubr.msk.bf16.mxu0 %vm367_vm1, %v785_v57  ;;  %v1047_v57 = vpack.c.bf16 %v5043_v56, %v5042_v51  ;;  %v5058_v51 = vld [vmem:[%s6887_s13 + $0xd4] sm:$0xff]  ;;  %v5059_v56 = vld [vmem:[%s6887_s13 + $0xdc] sm:$0xff] }
  0x5b   : > { %5819 = vmatmul.mubr.msk.bf16.gmra.mrb[12].mxu0 %vm367_vm1, %v786_v62  ;;  %v5044_v62 = vld [vmem:[%s6887_s13 + $0x64] sm:$0xff] }
  0x5c   : > { %5822 = vmatprep.mubr.msk.bf16.mxu0 %vm367_vm1, %v787_v63  ;;  %v5045_v63 = vld [vmem:[%s6887_s13 + $0x6c] sm:$0xff] }
  0x63   : > { %5823 = vmatmul.mubr.msk.bf16.gmra.mrb[16].mxu0 %vm367_vm1, %v788_v6  ;;  %v5046_v6 = vld [vmem:[%s6887_s13 + $0x74] sm:$0xff] }
  0x64   : > { %5826 = vmatprep.mubr.msk.bf16.mxu0 %vm367_vm1, %v789_v7  ;;  %v5047_v7 = vld [vmem:[%s6887_s13 + $0x7c] sm:$0xff] }
  0x6b   : > { %5827 = vmatmul.mubr.msk.bf16.gmra.mrb[20].mxu0 %vm367_vm1, %v790_v13  ;;  %v1048_v13 = vpack.c.bf16 %v5045_v63, %v5044_v62  ;;  %v5060_v62 = vld [vmem:[%s6887_s13 + $0xe4] sm:$0xff]  ;;  %v5061_v63 = vld [vmem:[%s6887_s13 + $0xec] sm:$0xf] }
  0x6c   : > { %5830 = vmatprep.mubr.msk.bf16.mxu0 %vm367_vm1, %v791_v18  ;;  %v1049_v18 = vpack.c.bf16 %v5047_v7, %v5046_v6  ;;  %v5077_v6 = vld [vmem:[%s6887_s13 + $0x15] sm:$0xff]  ;;  %v5078_v7 = vld [vmem:[%s6887_s13 + $0x1d] sm:$0xff] }
  0x73   : > { %5831 = vmatmul.mubr.msk.bf16.gmra.mrb[24].mxu0 %vm367_vm1, %v792_v31  ;;  %v5051_v31 = vld [vmem:[%s6887_s13 + $0x9c] sm:$0xff] }
  0x74   : > { %5836 = vmatprep.mubr.msk.bf16.mxu0 %vm367_vm1, %v1043_v34  ;;  %v1050_v34 = vpack.c.bf16 %v5049_v25, %v5048_v24  ;;  %v1051_v35 = vpack.c.bf16 %v5051_v31, %v5050_v30  ;;  %v5079_v24 = vld [vmem:[%s6887_s13 + $0x25] sm:$0xff]  ;;  %v5080_v25 = vld [vmem:[%s6887_s13 + $0x2d] sm:$0xff]  ;;  %v5081_v30 = vld [vmem:[%s6887_s13 + $0x35] sm:$0xff] }
  0x75   : > { %v5082_v31 = vld [vmem:[%s6887_s13 + $0x3d] sm:$0xff] }
  0x7b   : > { %5837 = vmatmul.mubr.msk.bf16.vlgmr.msra.gmra.mrb[0].mxu0 %vm367_vm1, %v1044_v39  ;;  %v5055_v39 = vld [vmem:[%s6887_s13 + $0xbc] sm:$0xff] }
  0x7c   : > { %5865 = vmatpush3.bf16.msra.mxu0 %v1366_v42  ;;  %5840 = vmatprep.mubr.msk.bf16.mxu0 %vm367_vm1, %v1045_v40  ;;  %v1052_v40 = vpack.c.bf16 %v5053_v37, %v5052_v36  ;;  %v1053_v42 = vpack.c.bf16 %v5055_v39, %v5054_v38  ;;  %v1630_v36 = vsel %vm410_vm0, %v5148_v43, 0  ;;  %v7140_v37 = vld [vmem:[%s8132_s1 + $0xc] sm:$0x3] }
  0x7d   : > { %6622 = vmatprep.subr.msk.bf16.mxu0 %vm410_vm0, %v5148_v43  ;;  %v5083_v38 = vld [vmem:[%s6887_s13 + $0x45] sm:$0xff]  ;;  %v5084_v39 = vld [vmem:[%s6887_s13 + $0x4d] sm:$0xff] }
  0x7e   : > { %v1310_v43 = vpack.c.bf16 %v5084_v39, %v5083_v38  ;;  %v5099_v38 = vld [vmem:[%s6887_s13 + $0xc5] sm:$0xff] }
  0x7f   : > { %v7171_v39 = vld [vmem:[%s6887_s13 + $0x29] sm:$0xff] }
  0x83   : > { %5841 = vmatmul.mubr.msk.bf16.gmra.mrb[4].mxu0 %vm367_vm1, %v1046_v45  ;;  %v1054_v45 = vpack.c.bf16 %v5057_v50, %v5056_v44  ;;  %v5087_v50 = vld [vmem:[%s6887_s13 + $0x65] sm:$0xff] }
  0x84   : > { %5844 = vmatprep.mubr.msk.bf16.mxu0 %vm367_vm1, %v1047_v57  ;;  %v1055_v57 = vpack.c.bf16 %v5059_v56, %v5058_v51  ;;  %v5088_v51 = vld [vmem:[%s6887_s13 + $0x6d] sm:$0xff]  ;;  %v5089_v56 = vld [vmem:[%s6887_s13 + $0x75] sm:$0xff] }
  0x8b   : > { %5845 = vmatmul.mubr.msk.bf16.gmra.mrb[8].mxu0 %vm367_vm1, %v1048_v13  ;;  %v1056_v13 = vpack.c.bf16 %v5061_v63, %v5060_v62  ;;  %v5091_v63 = vld [vmem:[%s6887_s13 + $0x85] sm:$0xff] }
  0x8c   : > { %5848 = vmatprep.mubr.msk.bf16.mxu0 %vm367_vm1, %v1049_v18  ;;  %v1307_v18 = vpack.c.bf16 %v5078_v7, %v5077_v6  ;;  %v5092_v6 = vld [vmem:[%s6887_s13 + $0x8d] sm:$0xff]  ;;  %v5093_v7 = vld [vmem:[%s6887_s13 + $0x95] sm:$0xff] }
  0x93   : > { %5849 = vmatmul.mubr.msk.bf16.gmra.mrb[12].mxu0 %vm367_vm1, %v1050_v34  ;;  %v1308_v34 = vpack.c.bf16 %v5080_v25, %v5079_v24  ;;  %v5095_v25 = vld [vmem:[%s6887_s13 + $0xa5] sm:$0xff] }
  0x94   : > { %5852 = vmatprep.mubr.msk.bf16.mxu0 %vm367_vm1, %v1051_v35  ;;  %v1309_v35 = vpack.c.bf16 %v5082_v31, %v5081_v30  ;;  %v5096_v30 = vld [vmem:[%s6887_s13 + $0xad] sm:$0xff]  ;;  %v5097_v31 = vld [vmem:[%s6887_s13 + $0xb5] sm:$0xff] }
  0x9b   : > { %5853 = vmatmul.mubr.msk.bf16.gmra.mrb[16].mxu0 %vm367_vm1, %v1052_v40  ;;  %v5085_v40 = vld [vmem:[%s6887_s13 + $0x55] sm:$0xff] }
  0x9c   : > { %5856 = vmatprep.mubr.msk.bf16.mxu0 %vm367_vm1, %v1053_v42  ;;  %v5086_v42 = vld [vmem:[%s6887_s13 + $0x5d] sm:$0xff] }
  0x9d   : > { %v1311_v44 = vpack.c.bf16 %v5086_v42, %v5085_v40  ;;  %v7174_v40 = vld [vmem:[%s6887_s13 + $0x31] sm:$0xff] }
  0x9e   : > { %v5100_v42 = vld [vmem:[%s6887_s13 + $0xcd] sm:$0xff] }
  0xa3   : > { %5857 = vmatmul.mubr.msk.bf16.gmra.mrb[20].mxu0 %vm367_vm1, %v1054_v45  ;;  %v5090_v45 = vld [vmem:[%s6887_s13 + $0x7d] sm:$0xff] }
  0xa4   : > { %5860 = vmatprep.mubr.msk.bf16.mxu0 %vm367_vm1, %v1055_v57  ;;  %v1312_v57 = vpack.c.bf16 %v5088_v51, %v5087_v50  ;;  %v1313_v62 = vpack.c.bf16 %v5090_v45, %v5089_v56  ;;  %v7184_v50 = vld [vmem:[%s6887_s13 + $0x41] sm:$0xff]  ;;  %v5101_v51 = vld [vmem:[%s6887_s13 + $0xd5] sm:$0xff]  ;;  %v7241_v45 = vld [vmem:[%s8132_s1 + $0xe] sm:$0x3] }
  0xa5   : > { %v5102_v56 = vld [vmem:[%s6887_s13 + $0xdd] sm:$0xff] }
  0xab   : > { %5861 = vmatmul.mubr.msk.bf16.gmra.mrb[24].mxu0 %vm367_vm1, %v1056_v13  ;;  %v5094_v13 = vld [vmem:[%s6887_s13 + $0x9d] sm:$0xff] }
  0xac   : > { %5866 = vmatprep.mubr.msk.bf16.mxu0 %vm367_vm1, %v1307_v18  ;;  %v1314_v18 = vpack.c.bf16 %v5092_v6, %v5091_v63  ;;  %v1315_v24 = vpack.c.bf16 %v5094_v13, %v5093_v7  ;;  %v5103_v63 = vld [vmem:[%s6887_s13 + $0xe5] sm:$0xff]  ;;  %v5104_v6 = vld [vmem:[%s6887_s13 + $0xed] sm:$0xf]  ;;  %v7198_v13 = vld [vmem:[%s6887_s13 + $0x51] sm:$0xff] }
  0xad   : > { %v7195_v7 = vld [vmem:[%s6887_s13 + $0x49] sm:$0xff] }
  0xb3   : > { %5867 = vmatmul.mubr.msk.bf16.vlgmr.msra.gmra.mrb[0].mxu0 %vm367_vm1, %v1308_v34  ;;  %v5098_v34 = vld [vmem:[%s6887_s13 + $0xbd] sm:$0xff] }
  0xb4   : > { %5895 = vmatpush3.bf16.msra.mxu0 %v1630_v36  ;;  %5870 = vmatprep.mubr.msk.bf16.mxu0 %vm367_vm1, %v1309_v35  ;;  %v1316_v35 = vpack.c.bf16 %v5096_v30, %v5095_v25  ;;  %v1317_v36 = vpack.c.bf16 %v5098_v34, %v5097_v31  ;;  %v5121_v25 = vld [vmem:[%s6887_s13 + $0x1e] sm:$0xff]  ;;  %v5127_v30 = vld [vmem:[%s6887_s13 + $0x4e] sm:$0xff] }
  0xb5   : > { %6623 = vmatprep.subr.msk.bf16.mxu0 %vm410_vm0, %v7140_v37  ;;  %v7208_v31 = vld [vmem:[%s6887_s13 + $0x61] sm:$0xff] }
  0xbb   : > { %5871 = vmatmul.mubr.msk.bf16.gmra.mrb[4].mxu0 %vm367_vm1, %v1310_v43  ;;  %v5128_v43 = vld [vmem:[%s6887_s13 + $0x56] sm:$0xff] }
  0xbc   : > { %5874 = vmatprep.mubr.msk.bf16.mxu0 %vm367_vm1, %v1311_v44  ;;  %v7181_v44 = vld [vmem:[%s6887_s13 + $0x39] sm:$0xff] }
  0xc3   : > { %5875 = vmatmul.mubr.msk.bf16.gmra.mrb[8].mxu0 %vm367_vm1, %v1312_v57  ;;  %v1318_v57 = vpack.c.bf16 %v5100_v42, %v5099_v38  ;;  %v5122_v38 = vld [vmem:[%s6887_s13 + $0x26] sm:$0xff] }
  0xc4   : > { %5878 = vmatprep.mubr.msk.bf16.mxu0 %vm367_vm1, %v1313_v62  ;;  %v1319_v62 = vpack.c.bf16 %v5102_v56, %v5101_v51  ;;  %v7215_v42 = vld [vmem:[%s6887_s13 + $0x69] sm:$0xff]  ;;  %v7218_v51 = vld [vmem:[%s6887_s13 + $0x71] sm:$0xff] }
  0xc5   : > { %v5123_v56 = vld [vmem:[%s6887_s13 + $0x2e] sm:$0xff] }
  0xcb   : > { %5879 = vmatmul.mubr.msk.bf16.gmra.mrb[12].mxu0 %vm367_vm1, %v1314_v18  ;;  %v7201_v18 = vld [vmem:[%s6887_s13 + $0x59] sm:$0xff] }
  0xcc   : > { %5882 = vmatprep.mubr.msk.bf16.mxu0 %vm367_vm1, %v1315_v24  ;;  %v5120_v24 = vld [vmem:[%s6887_s13 + $0x16] sm:$0xff] }
  0xd3   : > { %5883 = vmatmul.mubr.msk.bf16.gmra.mrb[16].mxu0 %vm367_vm1, %v1316_v35  ;;  %v1320_v35 = vpack.c.bf16 %v5104_v6, %v5103_v63  ;;  %v7228_v63 = vld [vmem:[%s6887_s13 + $0x81] sm:$0xff]  ;;  %v5124_v6 = vld [vmem:[%s6887_s13 + $0x36] sm:$0xff] }
  0xd4   : > { %5886 = vmatprep.mubr.msk.bf16.mxu0 %vm367_vm1, %v1317_v36  ;;  %v1571_v36 = vpack.c.bf16 %v5121_v25, %v5120_v24  ;;  %v5125_v24 = vld [vmem:[%s6887_s13 + $0x3e] sm:$0xff] }
  0xd5   : > { %v1573_v34 = vpack.c.bf16 %v5125_v24, %v5124_v6  ;;  %v4935_v6 = vld [vmem:[%s6887_s13 + $0x9] sm:$0xff] }
  0xdb   : > { %5887 = vmatmul.mubr.msk.bf16.gmra.mrb[20].mxu0 %vm367_vm1, %v1318_v57  ;;  %v5126_v57 = vld [vmem:[%s6887_s13 + $0x46] sm:$0xff] }
  0xdc   : > { %5890 = vmatprep.mubr.msk.bf16.mxu0 %vm367_vm1, %v1319_v62  ;;  %v7225_v62 = vld [vmem:[%s6887_s13 + $0x79] sm:$0xff]  ;;  %v1574_v12 = vpack.c.bf16 %v5127_v30, %v5126_v57  ;;  %v5131_v30 = vld [vmem:[%s6887_s13 + $0x6e] sm:$0xff] }
  0xdd   : > { %v5132_v57 = vld [vmem:[%s6887_s13 + $0x76] sm:$0xff] }
  0xe3   : > { %5891 = vmatmul.mubr.msk.bf16.gmra.mrb[24].mxu0 %vm367_vm1, %v1320_v35  ;;  %v1572_v35 = vpack.c.bf16 %v5123_v56, %v5122_v38  ;;  %v5129_v38 = vld [vmem:[%s6887_s13 + $0x5e] sm:$0xff] }
  0xe4   : > { %5896 = vmatprep.mubr.msk.bf16.mxu0 %vm367_vm1, %v1571_v36  ;;  %v1894_v36 = vsel %vm410_vm0, %v7140_v37, 0  ;;  %v4962_v56 = vld [vmem:[%s8132_s1 + $0x2] sm:$0x3]  ;;  %v1575_v19 = vpack.c.bf16 %v5129_v38, %v5128_v43  ;;  %v7294_v43 = vld [vmem:[%s6887_s13 + $0xb9] sm:$0xff] }
  0xe5   : > { %v4934_v37 = vld [vmem:[%s6887_s13 + $0x1] sm:$0xff]  ;;  %v412_v24 = vsel %vm410_vm0, %v4962_v56, 0  ;;  %6616 = vmatprep.subr.msk.bf16.mxu1 %vm410_vm0, %v4962_v56  ;;  %v355_v56 = vpack.c.bf16 %v7195_v7, %v7184_v50 }
  0xe6   : > { %v351_v25 = vpack.c.bf16 %v4935_v6, %v4934_v37  ;;  %5745 = vmatpush3.bf16.msra.mxu1 %v412_v24  ;;  %v5130_v6 = vld [vmem:[%s6887_s13 + $0x66] sm:$0xff]  ;;  %v7286_v37 = vld [vmem:[%s6887_s13 + $0xb1] sm:$0xff]  ;;  %v5133_v38 = vld [vmem:[%s6887_s13 + $0x7e] sm:$0xff] }
  0xe7   : > { %6618 = vmatprep.subr.msk.bf16.mxu1 %vm410_vm0, %v6865_v0  ;;  %v7283_v24 = vld [vmem:[%s6887_s13 + $0xa9] sm:$0xff] }
  0xe8   : > { %5746 = vmatprep.mubr.msk.bf16.mxu1 %vm367_vm1, %v351_v25  ;;  %v4938_v25 = vld [vmem:[%s6887_s13 + $0x21] sm:$0xff] }
  0xe9   : > { %5747 = vmatmul.mubr.msk.bf16.vlgmr.msra.gmra.mrb[0].mxu1 %vm367_vm1, %v352_v11  ;;  %v353_v0 = vpack.c.bf16 %v7171_v39, %v4938_v25  ;;  %v1576_v25 = vpack.c.bf16 %v5131_v30, %v5130_v6  ;;  %v1577_v11 = vpack.c.bf16 %v5133_v38, %v5132_v57  ;;  %v5135_v6 = vld [vmem:[%s6887_s13 + $0x8e] sm:$0xff]  ;;  %v5137_v57 = vld [vmem:[%s6887_s13 + $0x9e] sm:$0xff]  ;;  %v356_v38 = vpack.c.bf16 %v7201_v18, %v7198_v13  ;;  %v5138_v30 = vld [vmem:[%s6887_s13 + $0xa6] sm:$0xff] }
  0xea   : > { %6231 = vmatpush3.bf16.msra.mxu1 %v6871_v1  ;;  %v7297_v1 = vld [vmem:[%s6887_s13 + $0xc1] sm:$0xff] }
  0xeb   : > { %5897 = vmatmul.mubr.msk.bf16.vlgmr.msra.gmra.mrb[0].mxu0 %vm367_vm1, %v1572_v35  ;;  %v7256_v35 = vld [vmem:[%s6887_s13 + $0x89] sm:$0xff]  ;;  %5750 = vmatprep.mubr.msk.bf16.mxu1 %vm367_vm1, %v353_v0  ;;  %v5136_v0 = vld [vmem:[%s6887_s13 + $0x96] sm:$0xff] }
  0xec   : > { %5925 = vmatpush3.bf16.msra.mxu0 %v1894_v36  ;;  %5900 = vmatprep.mubr.msk.bf16.mxu0 %vm367_vm1, %v1573_v34  ;;  %v7265_v34 = vld [vmem:[%s6887_s13 + $0x99] sm:$0xff]  ;;  %v7268_v36 = vld [vmem:[%s6887_s13 + $0xa1] sm:$0xff] }
  0xed   : > { %6624 = vmatprep.subr.msk.bf16.mxu0 %vm410_vm0, %v7241_v45 }
  0xf3   : > { %5901 = vmatmul.mubr.msk.bf16.gmra.mrb[4].mxu0 %vm367_vm1, %v1574_v12  ;;  %v354_v12 = vpack.c.bf16 %v7181_v44, %v7174_v40 }
  0xf4   : > { %5904 = vmatprep.mubr.msk.bf16.mxu0 %vm367_vm1, %v1575_v19  ;;  %v5134_v19 = vld [vmem:[%s6887_s13 + $0x86] sm:$0xff] }
  0xf5   : > { %5751 = vmatmul.mubr.msk.bf16.gmra.mrb[4].mxu1 %vm367_vm1, %v354_v12  ;;  %v1578_v12 = vpack.c.bf16 %v5135_v6, %v5134_v19  ;;  %v358_v19 = vpack.c.bf16 %v7225_v62, %v7218_v51 }
  0xf6   : > { %5754 = vmatprep.mubr.msk.bf16.mxu1 %vm367_vm1, %v355_v56  ;;  %v5139_v56 = vld [vmem:[%s6887_s13 + $0xae] sm:$0xff] }
  0xf7   : > { %v1580_v6 = vpack.c.bf16 %v5139_v56, %v5138_v30  ;;  %v361_v56 = vpack.c.bf16 %v7283_v24, %v7268_v36 }
  0xfb   : > { %5905 = vmatmul.mubr.msk.bf16.gmra.mrb[8].mxu0 %vm367_vm1, %v1576_v25  ;;  %v1579_v25 = vpack.c.bf16 %v5137_v57, %v5136_v0  ;;  %v1581_v0 = vpack.c.bf16 %v5141_v3, %v5140_v4  ;;  %v359_v57 = vpack.c.bf16 %v7256_v35, %v7228_v63  ;;  %v360_v3 = vpack.c.bf16 %v7265_v34, %v7262_v10 }
  0xfc   : > { %5908 = vmatprep.mubr.msk.bf16.mxu0 %vm367_vm1, %v1577_v11  ;;  %v357_v11 = vpack.c.bf16 %v7215_v42, %v7208_v31 }
  0xfd   : > { %5755 = vmatmul.mubr.msk.bf16.gmra.mrb[8].mxu1 %vm367_vm1, %v356_v38  ;;  %v5142_v38 = vld [vmem:[%s6887_s13 + $0xc6] sm:$0xff] }
  0xfe   : > { %5758 = vmatprep.mubr.msk.bf16.mxu1 %vm367_vm1, %v357_v11  ;;  %v5145_v11 = vld [vmem:[%s6887_s13 + $0xde] sm:$0xff] }
 0x103   : > { %5909 = vmatmul.mubr.msk.bf16.gmra.mrb[12].mxu0 %vm367_vm1, %v1578_v12  ;;  %v5143_v12 = vld [vmem:[%s6887_s13 + $0xce] sm:$0xff] }
 0x104   : > { %5912 = vmatprep.mubr.msk.bf16.mxu0 %vm367_vm1, %v1579_v25  ;;  %v5144_v25 = vld [vmem:[%s6887_s13 + $0xd6] sm:$0xff]  ;;  %v1582_v4 = vpack.c.bf16 %v5143_v12, %v5142_v38  ;;  %v1835_v38 = vpack.c.bf16 %v6906_v14, %v6895_v9  ;;  %v363_v12 = vpack.c.bf16 %v7311_v8, %v7297_v1  ;;  %v1837_v9 = vpack.c.bf16 %v6925_v20, %v6915_v17 }
 0x105   : > { %5759 = vmatmul.mubr.msk.bf16.gmra.mrb[12].mxu1 %vm367_vm1, %v358_v19  ;;  %v1583_v30 = vpack.c.bf16 %v5145_v11, %v5144_v25  ;;  %v5146_v19 = vld [vmem:[%s6887_s13 + $0xe6] sm:$0xff]  ;;  %v4961_v25 = vld [vmem:[%s6887_s13 + $0xd9] sm:$0xf]  ;;  %v2158_v14 = vsel %vm410_vm0, %v7241_v45, 0  ;;  %v1838_v45 = vpack.c.bf16 %v6931_v22, %v6928_v21  ;;  %v1840_v22 = vpack.c.bf16 %v6949_v28, %v6946_v27 }
 0x106   : > { %5762 = vmatprep.mubr.msk.bf16.mxu1 %vm367_vm1, %v359_v57  ;;  %v364_v11 = vpack.c.bf16 %v4961_v25, %v7314_v5  ;;  %v5181_v17 = vld [vmem:[%s6887_s13 + $0xb8] sm:$0xff] }
 0x107   : > { %v5185_v28 = vld [vmem:[%s6887_s13 + $0xd8] sm:$0xff] }
 0x10b   : > { %5913 = vmatmul.mubr.msk.bf16.gmra.mrb[16].mxu0 %vm367_vm1, %v1580_v6  ;;  %v5147_v6 = vld [vmem:[%s6887_s13 + $0xee] sm:$0xf] }
 0x10c   : > { %5916 = vmatprep.mubr.msk.bf16.mxu0 %vm367_vm1, %v1581_v0  ;;  %v362_v0 = vpack.c.bf16 %v7294_v43, %v7286_v37  ;;  %v1584_v57 = vpack.c.bf16 %v5147_v6, %v5146_v19  ;;  %v1839_v19 = vpack.c.bf16 %v6943_v26, %v6934_v23  ;;  %v5182_v6 = vld [vmem:[%s6887_s13 + $0xc0] sm:$0xff]  ;;  %v1841_v23 = vpack.c.bf16 %v6961_v32, %v6952_v29 }
 0x10d   : > { %5763 = vmatmul.mubr.msk.bf16.gmra.mrb[16].mxu1 %vm367_vm1, %v360_v3  ;;  %v1836_v3 = vpack.c.bf16 %v6912_v16, %v6909_v15  ;;  %v5180_v16 = vld [vmem:[%s6887_s13 + $0xb0] sm:$0xff]  ;;  %v5186_v29 = vld [vmem:[%s6887_s13 + $0xe0] sm:$0xff]  ;;  %v6794_v32 = vmov 0  }
 0x10e   : > { %5766 = vmatprep.mubr.msk.bf16.mxu1 %vm367_vm1, %v361_v56  ;;  %v7382_v56 = vld [vmem:[%s8132_s1 + $0x10] sm:$0x3]  ;;  %v317_v20 = vpack.c.bf16 %v5181_v17, %v5180_v16  ;;  %6669 = vset.pattern.permute.xlu0 %v6794_v32 }
 0x10f   : > { %6680 = vset.pattern.permute.xlu1 %v6794_v32 }
 0x113   : > { %5917 = vmatmul.mubr.msk.bf16.gmra.mrb[20].mxu0 %vm367_vm1, %v1582_v4  ;;  %v5178_v4 = vld [vmem:[%s6887_s13 + $0xa0] sm:$0xff] }
 0x114   : > { %5920 = vmatprep.mubr.msk.bf16.mxu0 %vm367_vm1, %v1583_v30  ;;  %v5179_v30 = vld [vmem:[%s6887_s13 + $0xa8] sm:$0xff]  ;;  %v1842_v26 = vpack.c.bf16 %v5178_v4, %v6964_v33  ;;  %v5188_v33 = vld [vmem:[%s6887_s13 + $0xf0] sm:$0xff] }
 0x115   : > { %5767 = vmatmul.mubr.msk.bf16.gmra.mrb[20].mxu1 %vm367_vm1, %v362_v0  ;;  %v316_v15 = vpack.c.bf16 %v5179_v30, %v5178_v4  ;;  %v5183_v0 = vld [vmem:[%s6887_s13 + $0xc8] sm:$0xff]  ;;  %v1843_v25 = vpack.c.bf16 %v5180_v16, %v5179_v30 }
 0x116   : > { %5770 = vmatprep.mubr.msk.bf16.mxu1 %vm367_vm1, %v363_v12  ;;  %v5184_v12 = vld [vmem:[%s6887_s13 + $0xd0] sm:$0xff]  ;;  %v5489_v4 = vld [vmem:[%s7424_s17 + $0x8] sm:$0xff]  }
 0x117   : > { %v1845_v27 = vpack.c.bf16 %v5184_v12, %v5183_v0  ;;  %v5443_v16 = vunpack.c.l.bf16 %v5489_v4 }
 0x11b   : > { %5921 = vmatmul.mubr.msk.bf16.gmra.mrb[24].mxu0 %vm367_vm1, %v1584_v57  ;;  %v318_v57 = vpack.c.bf16 %v5183_v0, %v5182_v6 }
 0x11c   : > { %5926 = vmatprep.mubr.msk.bf16.mxu0 %vm367_vm1, %v1835_v38  ;;  %v305_v38 = vld [vmem:[%s6887_s13 + $0xd8] sm:$0xf] }
 0x11d   : > { %5771 = vmatmul.mubr.msk.bf16.gmra.mrb[24].mxu1 %vm367_vm1, %v364_v11  ;;  %v319_v21 = vpack.c.bf16 %v305_v38, %v5184_v12  ;;  %v1844_v11 = vpack.c.bf16 %v5182_v6, %v5181_v17  ;;  %v5444_v17 = vunpack.c.h.bf16 %v5489_v4  ;;  %v5492_v6 = vld [vmem:[%s7424_s17 + $0x20] sm:$0xff]  }
 0x11e   : > { %5796 = vmatprep.mubr.msk.bf16.mxu1 %vm367_vm1, %v316_v15 }
 0x123   : > { %5927 = vmatmul.mubr.msk.bf16.vlgmr.msra.gmra.mrb[0].mxu0 %vm367_vm1, %v1836_v3  ;;  %v5187_v3 = vld [vmem:[%s6887_s13 + $0xe8] sm:$0xff] }
 0x124   : > { %5955 = vmatpush3.bf16.msra.mxu0 %v2158_v14  ;;  %5930 = vmatprep.mubr.msk.bf16.mxu0 %vm367_vm1, %v1837_v9  ;;  %v1846_v9 = vpack.c.bf16 %v5186_v29, %v5185_v28  ;;  %v5438_v14 = vld [vmem:[%s7424_s17] sm:$0xff]   ;;  %v5494_v29 = vld [vmem:[%s7424_s17 + $0x30] sm:$0xff]  }
 0x125   : > { %6625 = vmatprep.subr.msk.bf16.mxu0 %vm410_vm0, %v7382_v56  ;;  %5797 = vmatmul.mubr.msk.bf16.vlgmr.msra.gmra.mrb[20].mxu1 %vm367_vm1, %v317_v20  ;;  %v5439_v30 = vunpack.c.l.bf16 %v5438_v14  ;;  %v5440_v15 = vunpack.c.h.bf16 %v5438_v14  ;;  %v5491_v20 = vld [vmem:[%s7424_s17 + $0x18] sm:$0xff]   ;;  %v5190_v28 = vld [vmem:[%s6887_s13 + $0x100] sm:$0xf]  ;;  %v5464_v14 = vunpack.c.h.bf16 %v5494_v29 }
 0x126   : > { %5800 = vmatprep.mubr.msk.bf16.mxu1 %vm367_vm1, %v318_v57  ;;  %v5452_v12 = vunpack.c.h.bf16 %v5491_v20 }
 0x127   : > { %v6670_v38 = vpack.i.bf16 %v5440_v15, %v5439_v30 }
 0x129   : > { %6671 = vperm.xlu0 %6669, %v6670_v38  }
 0x12b   : > { %5931 = vmatmul.mubr.msk.bf16.gmra.mrb[4].mxu0 %vm367_vm1, %v1838_v45  ;;  %v5490_v45 = vld [vmem:[%s7424_s17 + $0x10] sm:$0xff]  }
 0x12c   : > { %5934 = vmatprep.mubr.msk.bf16.mxu0 %vm367_vm1, %v1839_v19  ;;  %v1847_v19 = vpack.c.bf16 %v5188_v33, %v5187_v3  ;;  %v5447_v0 = vunpack.c.l.bf16 %v5490_v45  ;;  %v5448_v57 = vunpack.c.h.bf16 %v5490_v45  ;;  %v5495_v3 = vld [vmem:[%s7424_s17 + $0x38] sm:$0xff]  }
 0x12d   : > { %5801 = vmatmul.mubr.msk.bf16.gmra.mrb[24].mxu1 %vm367_vm1, %v319_v21  ;;  %v5493_v21 = vld [vmem:[%s7424_s17 + $0x28] sm:$0xff]   ;;  %v5467_v4 = vunpack.c.l.bf16 %v5495_v3 }
 0x12e   : > { %2742 = vperm.xlu1 %6680, %v5447_v0   ;;  %v5460_v15 = vunpack.c.h.bf16 %v5493_v21 }
 0x12f   : > { %v6701_v45 = vpack.i.bf16 %v5467_v4, %v5464_v14  ;;  %v8156_v4 = vpack.c.bf16 %v7198_v13, %v7195_v7  ;;  %v8158_v13 = vpack.c.bf16 %v7218_v51, %v7215_v42  ;;  %v8162_v42 = vpack.c.bf16 %v7286_v37, %v7283_v24  ;;  %v5232_v37 = vld [vmem:[%s6887_s13 + $0xf9] sm:$0xff]  ;;  %v5233_v24 = vld [vmem:[%s6887_s13 + $0x101] sm:$0xf] }
 0x130   : > { %v8163_v51 = vpack.c.bf16 %v7297_v1, %v7294_v43  ;;  %v2112_v43 = vpack.c.bf16 %v5233_v24, %v5232_v37  ;;  %v2363_v1 = vpack.c.bf16 %v6986_v46, %v6976_v41  ;;  %v2367_v41 = vpack.c.bf16 %v7023_v58, %v7014_v55  ;;  %v8169_v58 = vld [vmem:[#allocation7_spill] sm:$0xff] }
 0x131   : > { %v2368_v46 = vpack.c.bf16 %v7029_v60, %v7026_v59  ;;  %v8170_v59 = vld [vmem:[#allocation8_spill] sm:$0xff]  ;;  %v7600_v37 = vld [vmem:[%s8133_s2] ss:$0 sm:$0xff] }
 0x132   : > { %v2372_v60 = vpack.c.bf16 %v8170_v59, %v8169_v58 }
 0x133   : > { %5935 = vmatmul.mubr.msk.bf16.gmra.mrb[8].mxu0 %vm367_vm1, %v1840_v22  ;;  %v5451_v22 = vunpack.c.l.bf16 %v5491_v20  ;;  %v5497_v20 = vld [vmem:[%s7424_s17 + $0x48] sm:$0xff]  }
 0x134   : > { %5938 = vmatprep.mubr.msk.bf16.mxu0 %vm367_vm1, %v1841_v23  ;;  %v6675_v23 = vpack.i.bf16 %v5444_v17, %v5443_v16  ;;  %v5463_v16 = vunpack.c.l.bf16 %v5494_v29  ;;  %v5496_v17 = vld [vmem:[%s7424_s17 + $0x40] sm:$0xff]  }
 0x135   : > { %v6681_v32 = vpack.i.bf16 %v5451_v22, %v5448_v57  ;;  %v5468_v57 = vunpack.c.h.bf16 %v5495_v3  ;;  %v5471_v38 = vunpack.c.l.bf16 %v5496_v17  ;;  %v8154_v22 = vpack.c.bf16 %v7174_v40, %v7171_v39  ;;  %v5500_v29 = vld [vmem:[%s7424_s17 + $0x60] sm:$0xff]  }
 0x136   : > { %6676 = vperm.xlu0 %6669, %v6675_v23   ;;  %v6696_v0 = vpack.i.bf16 %v5463_v16, %v5460_v15  ;;  %v8155_v40 = vpack.c.bf16 %v7184_v50, %v7181_v44  ;;  %v5487_v14 = vunpack.c.l.bf16 %v5500_v29  ;;  %v8157_v16 = vpack.c.bf16 %v7208_v31, %v7201_v18 }
 0x137   : > { %6682 = vperm.xlu1 %6680, %v6681_v32   ;;  %v2422_v32 = vsel %vm410_vm0, %v7382_v56, 0  ;;  %v5488_v56 = vunpack.c.h.bf16 %v5500_v29  ;;  %v8160_v18 = vpack.c.bf16 %v7262_v10, %v7256_v35  ;;  %v8161_v31 = vpack.c.bf16 %v7268_v36, %v7265_v34  ;;  %v5230_v35 = vld [vmem:[%s6887_s13 + $0xe9] sm:$0xff]  ;;  %v5231_v34 = vld [vmem:[%s6887_s13 + $0xf1] sm:$0xff] }
 0x138   : > { %v8164_v10 = vpack.c.bf16 %v7314_v5, %v7311_v8  ;;  %v2364_v5 = vpack.c.bf16 %v6992_v48, %v6989_v47  ;;  %v2365_v8 = vpack.c.bf16 %v7005_v52, %v6995_v49  ;;  %v2369_v47 = vpack.c.bf16 %v7041_v2, %v7032_v61  ;;  %v8165_v48 = vld [vmem:[#allocation3_spill] sm:$0xff]  ;;  %v8166_v49 = vld [vmem:[#allocation4_spill] sm:$0xff]  ;;  %v8171_v61 = vld [vmem:[#allocation9_spill] sm:$0xff] }
 0x139   : > { %v2370_v52 = vpack.c.bf16 %v8166_v49, %v8165_v48  ;;  %v8172_v2 = vld [vmem:[#allocation10_spill] sm:$0xff] }
 0x13b   : > { %5939 = vmatmul.mubr.msk.bf16.gmra.mrb[12].mxu0 %vm367_vm1, %v1842_v26  ;;  %v5455_v26 = vunpack.c.l.bf16 %v5492_v6 }
 0x13c   : > { %5942 = vmatprep.mubr.msk.bf16.mxu0 %vm367_vm1, %v1843_v25  ;;  %v5456_v25 = vunpack.c.h.bf16 %v5492_v6  ;;  %v5475_v6 = vunpack.c.l.bf16 %v5497_v20 }
 0x143   : > { %5943 = vmatmul.mubr.msk.bf16.gmra.mrb[16].mxu0 %vm367_vm1, %v1844_v11  ;;  %v5459_v11 = vunpack.c.l.bf16 %v5493_v21  ;;  %v5499_v21 = vld [vmem:[%s7424_s17 + $0x58] sm:$0xff]  }
 0x144   : > { %5946 = vmatprep.mubr.msk.bf16.mxu0 %vm367_vm1, %v1845_v27  ;;  %v5189_v27 = vld [vmem:[%s6887_s13 + $0xf8] sm:$0xff] }
 0x145   : > { %v6691_v33 = vpack.i.bf16 %v5459_v11, %v5456_v25  ;;  %v1848_v30 = vpack.c.bf16 %v5190_v28, %v5189_v27  ;;  %v5483_v25 = vunpack.c.l.bf16 %v5499_v21  ;;  %v6706_v11 = vpack.i.bf16 %v5471_v38, %v5468_v57  ;;  %v5273_v57 = vld [vmem:[%s6887_s13 + $0xea] sm:$0xff]  ;;  %v5274_v38 = vld [vmem:[%s6887_s13 + $0xf2] sm:$0xff] }
 0x146   : > { %v5476_v27 = vunpack.c.h.bf16 %v5497_v20  ;;  %v2111_v20 = vpack.c.bf16 %v5231_v34, %v5230_v35  ;;  %v7594_v34 = vld [vmem:[%s8134_s3] sm:$0xff]  }
 0x147   : > { %6692 = vperm.xlu1 %6680, %v6691_v33   ;;  %v5484_v33 = vunpack.c.h.bf16 %v5499_v21  ;;  %v5275_v21 = vld [vmem:[%s6887_s13 + $0xfa] sm:$0xff] }
 0x149   : > { %v6726_v15 = vpack.i.bf16 %v5487_v14, %v5484_v33 }
 0x14b   : > { %5947 = vmatmul.mubr.msk.bf16.gmra.mrb[20].mxu0 %vm367_vm1, %v1846_v9  ;;  %v6686_v9 = vpack.i.bf16 %v5455_v26, %v5452_v12  ;;  %v5498_v12 = vld [vmem:[%s7424_s17 + $0x50] sm:$0xff]   ;;  %6702 = vperm.xlu1 %6680, %v6701_v45   ;;  %v2366_v45 = vpack.c.bf16 %v7011_v54, %v7008_v53  ;;  %v8168_v54 = vld [vmem:[#allocation6_spill] sm:$0xff] }
 0x14c   : > { %5950 = vmatprep.mubr.msk.bf16.mxu0 %vm367_vm1, %v1847_v19  ;;  %v5472_v19 = vunpack.c.h.bf16 %v5496_v17  ;;  %v5480_v26 = vunpack.c.h.bf16 %v5498_v12  ;;  %v5479_v28 = vunpack.c.l.bf16 %v5498_v12  ;;  %v8159_v17 = vpack.c.bf16 %v7228_v63, %v7225_v62  ;;  %v5228_v62 = vld [vmem:[%s6887_s13 + $0xd9] sm:$0xff]  ;;  %v5229_v63 = vld [vmem:[%s6887_s13 + $0xe1] sm:$0xff]  ;;  %v8167_v53 = vld [vmem:[#allocation5_spill] sm:$0xff] }
 0x14d   : > { %6687 = vperm.xlu0 %6669, %v6686_v9   ;;  %v2691_v9 = vld [vmem:[%s7424_s17 + $0x6c] sm:$0x3]  ;;  %v2110_v36 = vpack.c.bf16 %v5229_v63, %v5228_v62  ;;  %v2371_v55 = vpack.c.bf16 %v8168_v54, %v8167_v53  ;;  %v2375_v12 = vpack.c.bf16 %v5274_v38, %v5273_v57 }
 0x14e   : > { %v6711_v23 = vpack.i.bf16 %v5475_v6, %v5472_v19  ;;  %v6721_v39 = vpack.i.bf16 %v5483_v25, %v5480_v26  ;;  %v6716_v3 = vpack.i.bf16 %v5479_v28, %v5476_v27  ;;  %v2719_v50 = vunpack.c.l.bf16 %v2691_v9  ;;  %v5271_v6 = vld [vmem:[%s6887_s13 + $0xda] sm:$0xff] }
 0x14f   : > { %v2373_v19 = vpack.c.bf16 %v8172_v2, %v8171_v61 }
 0x150   : > { %6712 = vperm.xlu1 %6680, %v6711_v23   ;;  %v5276_v23 = vld [vmem:[%s6887_s13 + $0x102] sm:$0xf] }
 0x151   : > { %6697 = vperm.xlu0 %6669, %v6696_v0   ;;  %v5272_v0 = vld [vmem:[%s6887_s13 + $0xe2] sm:$0xff]  ;;  %v2376_v26 = vpack.c.bf16 %v5276_v23, %v5275_v21 }
 0x153   : > { %5951 = vmatmul.mubr.msk.bf16.gmra.mrb[24].mxu0 %vm367_vm1, %v1848_v30  ;;  %v2690_v30 = vld [vmem:[%s7424_s17 + $0x68] sm:$0xf] }
 0x154   : > { %5956 = vmatprep.mubr.msk.bf16.mxu0 %vm367_vm1, %v8154_v22  ;;  %6722 = vperm.xlu1 %6680, %v6721_v39   ;;  %v2718_v44 = vunpack.c.l.bf16 %v2690_v30  ;;  %v2374_v22 = vpack.c.bf16 %v5272_v0, %v5271_v6 }
 0x155   : > { %6707 = vperm.xlu0 %6669, %v6706_v11  }
 0x156   : > { %v6731_v7 = vpack.i.bf16 %v2719_v50, %v2718_v44 }
 0x158   : > { %2847 = vperm.xlu1 %6680, %v5488_v56  }
 0x159   : > { %6717 = vperm.xlu0 %6669, %v6716_v3  }
 0x15b   : > { %5957 = vmatmul.mubr.msk.bf16.vlgmr.msra.gmra.mrb[0].mxu0 %vm367_vm1, %v8155_v40 }
 0x15c   : > { %5985 = vmatpush3.bf16.msra.mxu0 %v2422_v32  ;;  %5960 = vmatprep.mubr.msk.bf16.mxu0 %vm367_vm1, %v8156_v4 }
 0x15d   : > { %6727 = vperm.xlu0 %6669, %v6726_v15  }
 0x161   : > { %6732 = vperm.xlu0 %6669, %v6731_v7  }
 0x163   : > { %5961 = vmatmul.mubr.msk.bf16.gmra.mrb[4].mxu0 %vm367_vm1, %v8157_v16 }
 0x164   : > { %5964 = vmatprep.mubr.msk.bf16.mxu0 %vm367_vm1, %v8158_v13  ;;  %v6736_v13 = vld [vmem:[%s8134_s3 + $0x10] sm:$0xff]  }
 0x165   : > { %6014 = vmatprep.subr.bf16.mxu1 %v6736_v13 }
 0x166   : > { %6015 = vmatpush3.bf16.msra.mxu1 %v6736_v13 }
 0x16b   : > { %5965 = vmatmul.mubr.msk.bf16.gmra.mrb[8].mxu0 %vm367_vm1, %v8159_v17  ;;  %v6737_v17 = vld [vmem:[%s8134_s3 + $0x18] sm:$0xff]  }
 0x16c   : > { %5968 = vmatprep.mubr.msk.bf16.mxu0 %vm367_vm1, %v8160_v18  ;;  %6016 = vmatprep.subr.bf16.mxu1 %v6737_v17 }
 0x16d   : > { %6017 = vmatpush3.bf16.msra.mxu1 %v6737_v17 }
 0x16e   : > { %6038 = vmatprep.subr.bf16.mxu1 %v7594_v34 }
 0x173   : > { %5969 = vmatmul.mubr.msk.bf16.gmra.mrb[12].mxu0 %vm367_vm1, %v8161_v31 }
 0x174   : > { %5972 = vmatprep.mubr.msk.bf16.mxu0 %vm367_vm1, %v8162_v42 }
 0x17b   : > { %5973 = vmatmul.mubr.msk.bf16.gmra.mrb[16].mxu0 %vm367_vm1, %v8163_v51 }
 0x17c   : > { %5976 = vmatprep.mubr.msk.bf16.mxu0 %vm367_vm1, %v8164_v10 }
 0x183   : > { %5977 = vmatmul.mubr.msk.bf16.gmra.mrb[20].mxu0 %vm367_vm1, %v2110_v36 }
 0x184   : > { %5980 = vmatprep.mubr.msk.bf16.mxu0 %vm367_vm1, %v2111_v20 }
 0x18b   : > { %5981 = vmatmul.mubr.msk.bf16.gmra.mrb[24].mxu0 %vm367_vm1, %v2112_v43 }
 0x18c   : > { %5986 = vmatprep.mubr.msk.bf16.mxu0 %vm367_vm1, %v2363_v1 }
 0x193   : > { %5987 = vmatmul.mubr.msk.bf16.vlgmr.msra.gmra.mrb[0].mxu0 %vm367_vm1, %v2364_v5 }
 0x194   : > { %5990 = vmatprep.mubr.msk.bf16.mxu0 %vm367_vm1, %v2365_v8 }
 0x19b   : > { %5991 = vmatmul.mubr.msk.bf16.gmra.mrb[4].mxu0 %vm367_vm1, %v2366_v45 }
 0x19c   : > { %5994 = vmatprep.mubr.msk.bf16.mxu0 %vm367_vm1, %v2367_v41 }
 0x1a3   : > { %5995 = vmatmul.mubr.msk.bf16.gmra.mrb[8].mxu0 %vm367_vm1, %v2368_v46 }
 0x1a4   : > { %5998 = vmatprep.mubr.msk.bf16.mxu0 %vm367_vm1, %v2369_v47 }
 0x1a8   : > { %v6672_v36 = vpop.permute.xlu0 %6671 }
 0x1a9   : > { %v6673_v48 = vunpack.i.l.bf16 %v6672_v36  ;;  %v6674_v59 = vunpack.i.h.bf16 %v6672_v36 }
 0x1ab   : > { %5999 = vmatmul.mubr.msk.bf16.gmra.mrb[12].mxu0 %vm367_vm1, %v2370_v52 }
 0x1ac   : > { %6002 = vmatprep.mubr.msk.bf16.mxu0 %vm367_vm1, %v2371_v55 }
 0x1ad   : > { %v2743_v49 = vpop.permute.xlu1 %2742 }
 0x1b3   : > { %6003 = vmatmul.mubr.msk.bf16.gmra.mrb[16].mxu0 %vm367_vm1, %v2372_v60 }
 0x1b4   : > { %6006 = vmatprep.mubr.msk.bf16.mxu0 %vm367_vm1, %v2373_v19 }
 0x1b5   : > { %v6677_v1 = vpop.permute.xlu0 %6676 }
 0x1b6   : > { %v6678_v45 = vunpack.i.l.bf16 %v6677_v1  ;;  %v6679_v54 = vunpack.i.h.bf16 %v6677_v1  ;;  %v6683_v21 = vpop.permute.xlu1 %6682 }
 0x1bb   : > { %6007 = vmatmul.mubr.msk.bf16.gmra.mrb[20].mxu0 %vm367_vm1, %v2374_v22 }
 0x1bc   : > { %6010 = vmatprep.mubr.msk.bf16.mxu0 %vm367_vm1, %v2375_v12  ;;  %v5748_v25 = vpop.f32.mrb[0].mxu1 }
 0x1bd   : > { %v448_v11 = vpop.f32.mrb[1].mxu1 }
 0x1be   : > { %v5749_v27 = vpop.f32.mrb[2].mxu1 }
 0x1bf   : > { %v451_v28 = vpop.f32.mrb[3].mxu1 }
 0x1c3   : > { %6011 = vmatmul.mubr.msk.bf16.gmra.mrb[24].mxu0 %vm367_vm1, %v2376_v26 }
 0x1c8   : > { %v5752_v29 = vpop.f32.mrb[4].mxu1 }
 0x1c9   : > { %v7543_v32 = vpop.f32.mrb[5].mxu1 }
 0x1ca   : > { %v7545_v39 = vpop.f32.mrb[6].mxu1 }
 0x1cb   : > { %v7547_v40 = vpop.f32.mrb[7].mxu1 }
 0x1cc   : > { %v6688_v36 = vpop.permute.xlu0 %6687 }
 0x1d0   : > { %v7549_v3 = vpop.f32.mrb[8].mxu1 }
 0x1d1   : > { %v7551_v33 = vpop.f32.mrb[9].mxu1 }
 0x1d2   : > { %v7553_v14 = vpop.f32.mrb[10].mxu1 }
 0x1d3   : > { %v7555_v4 = vpop.f32.mrb[11].mxu1 }
 0x1d8   : > { %v7557_v30 = vpop.f32.mrb[12].mxu1 }
 0x1d9   : > { %v7559_v9 = vpop.f32.mrb[13].mxu1 }
 0x1da   : > { %v7561_v56 = vpop.f32.mrb[14].mxu1 }
 0x1db   : > { %v7563_v15 = vpop.f32.mrb[15].mxu1 }
 0x1e0   : > { %v7565_v44 = vpop.f32.mrb[16].mxu1 }
 0x1e1   : > { %v7567_v50 = vpop.f32.mrb[17].mxu1 }
 0x1e2   : > { %v7569_v16 = vpop.f32.mrb[18].mxu1 }
 0x1e3   : > { %v7571_v7 = vpop.f32.mrb[19].mxu1 }
 0x1f8   : > { %v7579_v18 = vpop.f32.mrb[20].mxu1 }
 0x1f9   : > { %v7581_v31 = vpop.f32.mrb[21].mxu1 }
 0x1fa   : > { %v7583_v42 = vpop.f32.mrb[22].mxu1 }
 0x1fb   : > { %v7585_v51 = vpop.f32.mrb[23].mxu1 }
 0x200   : > { %v5802_v10 = vpop.f32.mrb[24].mxu1 }
 0x201   : > { %v7587_v62 = vpop.f32.mrb[25].mxu1 }
 0x202   : > { %v5803_v63 = vpop.f32.mrb[26].mxu1 }
 0x203   : > { %v7589_v35 = vpop.f32.mrb[27].mxu1 }
 0x266   : > { %v5988_v20 = vpop.f32.mrb[0].mxu0 }
 0x267   : > { %v6232_v24 = vadd.f32 %v5988_v20, %v5748_v25  ;;  %v2458_v43 = vpop.f32.mrb[1].mxu0 }
 0x268   : > { %v6233_v5 = vadd.f32 %v2458_v43, %v448_v11  ;;  %v5989_v8 = vpop.f32.mrb[2].mxu0  ;;  %v6685_v11 = vunpack.i.h.bf16 %v6683_v21  ;;  %v6689_v43 = vunpack.i.l.bf16 %v6688_v36 }
 0x269   : > { %v2606_v41 = vadd.f32 %v6232_v24, %v7600_v37  ;;  %v6234_v46 = vadd.f32 %v5989_v8, %v5749_v27  ;;  %v2461_v47 = vpop.f32.mrb[3].mxu0 }
 0x26a   : > { %v2604_v52 = vadd.f32 %v6233_v5, %v7600_v37  ;;  %v6235_v53 = vadd.f32 %v2461_v47, %v451_v28 }
 0x26b   : > { %v2634_v55 = vmax.f32 %v2606_v41, 0.0  ;;  %v2607_v58 = vadd.f32 %v6234_v46, %v7600_v37 }
 0x26c   : > { %v2632_v60 = vmax.f32 %v2604_v52, 0.0  ;;  %v2605_v61 = vadd.f32 %v6235_v53, %v7600_v37 }
 0x26d   : > { %v2862_v2 = vmul.f32 %v6678_v45, %v2634_v55  ;;  %v2635_v19 = vmax.f32 %v2607_v58, 0.0 }
 0x26e   : > { %v2860_v6 = vmul.f32 %v6673_v48, %v2632_v60  ;;  %v2633_v0 = vmax.f32 %v2605_v61, 0.0  ;;  %v5992_v57 = vpop.f32.mrb[4].mxu0 }
 0x26f   : > { %2891 = vst.msk [vmem:[#allocation2 + $0x10] sm:$0xff] %vm2888_vm2, %v2862_v2  ;;  %v2863_v38 = vmul.f32 %v6679_v54, %v2635_v19  ;;  %v6236_v22 = vadd.f32 %v5992_v57, %v5752_v29  ;;  %v2474_v12 = vpop.f32.mrb[5].mxu0 }
 0x270   : > { %2889 = vst.msk [vmem:[#allocation2] sm:$0xff] %vm2888_vm2, %v2860_v6  ;;  %v2861_v23 = vmul.f32 %v6674_v59, %v2633_v0  ;;  %v6237_v26 = vadd.f32 %v2474_v12, %v7543_v32  ;;  %v5993_v25 = vpop.f32.mrb[6].mxu0  ;;  %v6684_v32 = vunpack.i.l.bf16 %v6683_v21  ;;  %v6693_v59 = vpop.permute.xlu1 %6692  ;;  %v6690_v6 = vunpack.i.h.bf16 %v6688_v36  ;;  %v6739_v36 = vld [vmem:[%s8134_s3 + $0x8] sm:$0xff]  }
 0x271   : > { %2892 = vst.msk [vmem:[#allocation2 + $0x18] sm:$0xff] %vm2888_vm2, %v2863_v38  ;;  %v2610_v27 = vadd.f32 %v6236_v22, %v7600_v37  ;;  %v6238_v28 = vadd.f32 %v5993_v25, %v7545_v39  ;;  %v2477_v13 = vpop.f32.mrb[7].mxu0  ;;  %v6695_v2 = vunpack.i.h.bf16 %v6693_v59  ;;  %v6698_v0 = vpop.permute.xlu0 %6697  ;;  %v6694_v21 = vunpack.i.l.bf16 %v6693_v59 }
 0x272   : > { %2890 = vst.msk [vmem:[#allocation2 + $0x8] sm:$0xff] %vm2888_vm2, %v2861_v23  ;;  %v2608_v29 = vadd.f32 %v6237_v26, %v7600_v37  ;;  %v6239_v17 = vadd.f32 %v2477_v13, %v7547_v40  ;;  %v6699_v38 = vunpack.i.l.bf16 %v6698_v0 }
 0x273   : > { %v2638_v10 = vmax.f32 %v2610_v27, 0.0  ;;  %v2611_v63 = vadd.f32 %v6238_v28, %v7600_v37 }
 0x274   : > { %v2636_v20 = vmax.f32 %v2608_v29, 0.0  ;;  %v2609_v24 = vadd.f32 %v6239_v17, %v7600_v37 }
 0x275   : > { %v2866_v1 = vmul.f32 %v6685_v11, %v2638_v10  ;;  %v2639_v5 = vmax.f32 %v2611_v63, 0.0 }
 0x276   : > { %v2864_v8 = vmul.f32 %v2743_v49, %v2636_v20  ;;  %v2637_v39 = vmax.f32 %v2609_v24, 0.0  ;;  %v5996_v45 = vpop.f32.mrb[8].mxu0 }
 0x277   : > { %2895 = vst.msk [vmem:[#allocation2 + $0x30] sm:$0xff] %vm2888_vm2, %v2866_v1  ;;  %v2867_v41 = vmul.f32 %v6689_v43, %v2639_v5  ;;  %v6240_v46 = vadd.f32 %v5996_v45, %v7549_v3  ;;  %v2490_v40 = vpop.f32.mrb[9].mxu0  ;;  %v6703_v5 = vpop.permute.xlu1 %6702 }
 0x278   : > { %2893 = vst.msk [vmem:[#allocation2 + $0x20] sm:$0xff] %vm2888_vm2, %v2864_v8  ;;  %v2865_v47 = vmul.f32 %v6684_v32, %v2637_v39  ;;  %v6241_v48 = vadd.f32 %v2490_v40, %v7551_v33  ;;  %v5997_v52 = vpop.f32.mrb[10].mxu0  ;;  %v2954_v28 = vld [vmem:[#allocation2 + $0x11] sm:$0xff]  ;;  %v6705_v45 = vunpack.i.h.bf16 %v6703_v5 }
 0x279   : > { %2896 = vst.msk [vmem:[#allocation2 + $0x38] sm:$0xff] %vm2888_vm2, %v2867_v41  ;;  %v2614_v53 = vadd.f32 %v6240_v46, %v7600_v37  ;;  %v6242_v49 = vadd.f32 %v5997_v52, %v7553_v14  ;;  %v2493_v54 = vpop.f32.mrb[11].mxu0  ;;  %v2952_v55 = vld [vmem:[#allocation2 + $0x1] sm:$0xff]  ;;  %v2953_v58 = vld [vmem:[#allocation2 + $0x9] sm:$0xff] }
 0x27a   : > { %2894 = vst.msk [vmem:[#allocation2 + $0x28] sm:$0xff] %vm2888_vm2, %v2865_v47  ;;  %v2612_v3 = vadd.f32 %v6241_v48, %v7600_v37  ;;  %v6243_v60 = vadd.f32 %v2493_v54, %v7555_v4  ;;  %v2972_v61 = vpack.c.bf16 %v2953_v58, %v2952_v55  ;;  %v6700_v47 = vunpack.i.h.bf16 %v6698_v0  ;;  %v7655_v48 = vpop.permute.xlu0 %6707 }
 0x27b   : > { %v2642_v33 = vmax.f32 %v2614_v53, 0.0  ;;  %v2615_v19 = vadd.f32 %v6242_v49, %v7600_v37  ;;  %v7662_v53 = vld [vmem:[%s8134_s3 + $0x20] sm:$0xff]   ;;  %v6709_v55 = vunpack.i.l.bf16 %v7655_v48 }
 0x27c   : > { %v2640_v57 = vmax.f32 %v2612_v3, 0.0  ;;  %v2613_v14 = vadd.f32 %v6243_v60, %v7600_v37  ;;  %6018 = vmatprep.mubr.msk.bf16.mxu1 %vm2888_vm2, %v2972_v61  ;;  %v6704_v3 = vunpack.i.l.bf16 %v6703_v5 }
 0x27d   : > { %v2870_v22 = vmul.f32 %v6695_v2, %v2642_v33  ;;  %v2643_v12 = vmax.f32 %v2615_v19, 0.0 }
 0x27e   : > { %v2868_v23 = vmul.f32 %v6690_v6, %v2640_v57  ;;  %v2641_v26 = vmax.f32 %v2613_v14, 0.0  ;;  %v6000_v25 = vpop.f32.mrb[12].mxu0  ;;  %v7653_v40 = vld [vmem:[#allocation2 + $0x30] sm:$0xff] }
 0x27f   : > { %2899 = vst.msk [vmem:[#allocation2 + $0x50] sm:$0xff] %vm2888_vm2, %v2870_v22  ;;  %v2871_v4 = vmul.f32 %v6699_v38, %v2643_v12  ;;  %v6244_v11 = vadd.f32 %v6000_v25, %v7557_v30  ;;  %v2506_v27 = vpop.f32.mrb[13].mxu0  ;;  %v2955_v13 = vld [vmem:[#allocation2 + $0x19] sm:$0xff] }
 0x280   : > { %2897 = vst.msk [vmem:[#allocation2 + $0x40] sm:$0xff] %vm2888_vm2, %v2868_v23  ;;  %v2869_v29 = vmul.f32 %v6694_v21, %v2641_v26  ;;  %v6245_v17 = vadd.f32 %v2506_v27, %v7559_v9  ;;  %v6001_v10 = vpop.f32.mrb[14].mxu0  ;;  %v2973_v63 = vpack.c.bf16 %v2955_v13, %v2954_v28  ;;  %v7651_v46 = vld [vmem:[#allocation2 + $0x31] sm:$0xff]  ;;  %v6713_v13 = vpop.permute.xlu1 %6712  ;;  %v2918_v38 = vld [vmem:[#allocation2] sm:$0xff] }
 0x281   : > { %2900 = vst.msk [vmem:[#allocation2 + $0x58] sm:$0xff] %vm2888_vm2, %v2871_v4  ;;  %v2618_v32 = vadd.f32 %v6244_v11, %v7600_v37  ;;  %v6246_v30 = vadd.f32 %v6001_v10, %v7561_v56  ;;  %v2509_v20 = vpop.f32.mrb[15].mxu0  ;;  %v2956_v24 = vld [vmem:[#allocation2 + $0x21] sm:$0xff]  ;;  %v7640_v43 = vld [vmem:[#allocation2 + $0x29] sm:$0xff]  ;;  %v6715_v10 = vunpack.i.h.bf16 %v6713_v13  ;;  %v3511_v33 = vld [vmem:[#allocation2 + $0x34] sm:$0xff] }
 0x282   : > { %v7642_v1 = vld [vmem:[#allocation2 + $0x28] sm:$0xff]  ;;  %2898 = vst.msk [vmem:[#allocation2 + $0x48] sm:$0xff] %vm2888_vm2, %v2869_v29  ;;  %v2616_v9 = vadd.f32 %v6245_v17, %v7600_v37  ;;  %v6247_v8 = vadd.f32 %v2509_v20, %v7563_v15  ;;  %6019 = vmatmul.mubr.msk.bf16.vlgmr.msra.gmra.mrb[28].mxu1 %vm2888_vm2, %v2973_v63  ;;  %v2974_v39 = vpack.c.bf16 %v7640_v43, %v2956_v24  ;;  %v6718_v20 = vpop.permute.xlu0 %6717 }
 0x283   : > { %v2646_v41 = vmax.f32 %v2618_v32, 0.0  ;;  %v2619_v56 = vadd.f32 %v6246_v30, %v7600_v37  ;;  %6039 = vmatpush3.bf16.msra.mxu1 %v7594_v34  ;;  %v7664_v49 = vld [vmem:[#allocation2 + $0x2a] sm:$0xff]  ;;  %v7666_v34 = vld [vmem:[#allocation2 + $0x32] sm:$0xff]  ;;  %v4157_v54 = vpack.c.bf16 %v7653_v40, %v7642_v1  ;;  %v6710_v30 = vunpack.i.h.bf16 %v7655_v48 }
 0x284   : > { %v2644_v52 = vmax.f32 %v2616_v9, 0.0  ;;  %v2617_v15 = vadd.f32 %v6247_v8, %v7600_v37  ;;  %6022 = vmatprep.mubr.msk.bf16.mxu1 %vm2888_vm2, %v2974_v39  ;;  %6040 = vmatprep.subr.bf16.mxu1 %v6739_v36  ;;  %v6719_v8 = vunpack.i.l.bf16 %v6718_v20 }
 0x285   : > { %v2874_v58 = vmul.f32 %v6705_v45, %v2646_v41  ;;  %v2647_v59 = vmax.f32 %v2619_v56, 0.0  ;;  %v6714_v56 = vunpack.i.l.bf16 %v6713_v13 }
 0x286   : > { %v2872_v60 = vmul.f32 %v6700_v47, %v2644_v52  ;;  %v2645_v61 = vmax.f32 %v2617_v15, 0.0  ;;  %v6004_v2 = vpop.f32.mrb[16].mxu0  ;;  %v7706_v32 = vld [vmem:[#allocation2 + $0x50] sm:$0xff] }
 0x287   : > { %2903 = vst.msk [vmem:[#allocation2 + $0x70] sm:$0xff] %vm2888_vm2, %v2874_v58  ;;  %v2875_v19 = vmul.f32 %v6709_v55, %v2647_v59  ;;  %v6248_v6 = vadd.f32 %v6004_v2, %v7565_v44  ;;  %v2522_v0 = vpop.f32.mrb[17].mxu0  ;;  %v7675_v57 = vld [vmem:[#allocation2 + $0x39] sm:$0xff]  ;;  %6041 = vmatpush3.bf16.msra.mxu1 %v6739_v36 }
 0x288   : > { %v7677_v14 = vld [vmem:[#allocation2 + $0x40] sm:$0xff]  ;;  %2901 = vst.msk [vmem:[#allocation2 + $0x60] sm:$0xff] %vm2888_vm2, %v2872_v60  ;;  %v2873_v22 = vmul.f32 %v6704_v3, %v2645_v61  ;;  %v6249_v12 = vadd.f32 %v2522_v0, %v7567_v50  ;;  %v6005_v21 = vpop.f32.mrb[18].mxu0  ;;  %v2975_v23 = vpack.c.bf16 %v7675_v57, %v7651_v46  ;;  %6062 = vmatprep.subr.bf16.mxu1 %v7662_v53  ;;  %v7686_v44 = vld [vmem:[#allocation2 + $0x38] sm:$0xff] }
 0x289   : > { %2904 = vst.msk [vmem:[#allocation2 + $0x78] sm:$0xff] %vm2888_vm2, %v2875_v19  ;;  %v2622_v26 = vadd.f32 %v6248_v6, %v7600_v37  ;;  %v6250_v25 = vadd.f32 %v6005_v21, %v7569_v16  ;;  %v2525_v4 = vpop.f32.mrb[19].mxu0  ;;  %v7691_v11 = vld [vmem:[#allocation2 + $0x41] sm:$0xff]  ;;  %v7693_v27 = vld [vmem:[#allocation2 + $0x49] sm:$0xff]  ;;  %v4158_v28 = vpack.c.bf16 %v7677_v14, %v7686_v44  ;;  %v7729_v0 = vld [vmem:[#allocation2 + $0x58] sm:$0xff] }
 0x28a   : > { %v7695_v50 = vld [vmem:[#allocation2 + $0x48] sm:$0xff]  ;;  %2902 = vst.msk [vmem:[#allocation2 + $0x68] sm:$0xff] %vm2888_vm2, %v2873_v22  ;;  %v2620_v29 = vadd.f32 %v6249_v12, %v7600_v37  ;;  %v6251_v17 = vadd.f32 %v2525_v4, %v7571_v7  ;;  %6023 = vmatmul.mubr.msk.bf16.gmra.mrb[32].mxu1 %vm2888_vm2, %v2975_v23  ;;  %v2976_v16 = vpack.c.bf16 %v7693_v27, %v7691_v11  ;;  %v7711_v7 = vld [vmem:[#allocation2 + $0x51] sm:$0xff]  ;;  %v6723_v4 = vpop.permute.xlu1 %6722 }
 0x28b   : > { %v2650_v63 = vmax.f32 %v2622_v26, 0.0  ;;  %v2623_v36 = vadd.f32 %v6250_v25, %v7600_v37  ;;  %v4159_v9 = vpack.c.bf16 %v7706_v32, %v7695_v50  ;;  %v7742_v25 = vpop.permute.xlu0 %6727 }
 0x28c   : > { %v2648_v24 = vmax.f32 %v2620_v29, 0.0  ;;  %v2621_v5 = vadd.f32 %v6251_v17, %v7600_v37  ;;  %6026 = vmatprep.mubr.msk.bf16.mxu1 %vm2888_vm2, %v2976_v16  ;;  %v6725_v17 = vunpack.i.h.bf16 %v6723_v4 }
 0x28d   : > { %v2878_v39 = vmul.f32 %v6715_v10, %v2650_v63  ;;  %v2651_v45 = vmax.f32 %v2623_v36, 0.0  ;;  %v6720_v36 = vunpack.i.h.bf16 %v6718_v20 }
 0x28e   : > { %v2876_v47 = vmul.f32 %v6710_v30, %v2648_v24  ;;  %v2649_v48 = vmax.f32 %v2621_v5, 0.0  ;;  %v6008_v52 = vpop.f32.mrb[20].mxu0  ;;  %v7751_v63 = vld [vmem:[#allocation2 + $0x70] sm:$0xff] }
 0x28f   : > { %2907 = vst.msk [vmem:[#allocation2 + $0x90] sm:$0xff] %vm2888_vm2, %v2878_v39  ;;  %v2879_v15 = vmul.f32 %v6719_v8, %v2651_v45  ;;  %v6252_v55 = vadd.f32 %v6008_v52, %v7579_v18  ;;  %v2538_v58 = vpop.f32.mrb[21].mxu0  ;;  %v7719_v59 = vld [vmem:[#allocation2 + $0x59] sm:$0xff]  ;;  %v6729_v8 = vunpack.i.l.bf16 %v7742_v25 }
 0x290   : > { %v7721_v3 = vld [vmem:[#allocation2 + $0x60] sm:$0xff]  ;;  %2905 = vst.msk [vmem:[#allocation2 + $0x80] sm:$0xff] %vm2888_vm2, %v2876_v47  ;;  %v2877_v61 = vmul.f32 %v6714_v56, %v2649_v48  ;;  %v6253_v2 = vadd.f32 %v2538_v58, %v7581_v31  ;;  %v6009_v19 = vpop.f32.mrb[22].mxu0  ;;  %v2977_v6 = vpack.c.bf16 %v7719_v59, %v7711_v7  ;;  %v7755_v5 = vld [vmem:[#allocation2 + $0x71] sm:$0xff]  ;;  %v6724_v56 = vunpack.i.l.bf16 %v6723_v4 }
 0x291   : > { %2908 = vst.msk [vmem:[#allocation2 + $0x98] sm:$0xff] %vm2888_vm2, %v2879_v15  ;;  %v2626_v18 = vadd.f32 %v6252_v55, %v7600_v37  ;;  %v6254_v22 = vadd.f32 %v6009_v19, %v7583_v42  ;;  %v2541_v12 = vpop.f32.mrb[23].mxu0  ;;  %v7734_v21 = vld [vmem:[#allocation2 + $0x61] sm:$0xff]  ;;  %v7736_v23 = vld [vmem:[#allocation2 + $0x69] sm:$0xff]  ;;  %v6733_v19 = vpop.permute.xlu0 %6732  ;;  %v7773_v4 = vld [vmem:[#allocation2 + $0x78] sm:$0xff] }
 0x292   : > { %v7738_v26 = vld [vmem:[#allocation2 + $0x68] sm:$0xff]  ;;  %2906 = vst.msk [vmem:[#allocation2 + $0x88] sm:$0xff] %vm2888_vm2, %v2877_v61  ;;  %v2624_v13 = vadd.f32 %v6253_v2, %v7600_v37  ;;  %v6255_v29 = vadd.f32 %v2541_v12, %v7585_v51  ;;  %6027 = vmatmul.mubr.msk.bf16.gmra.mrb[36].mxu1 %vm2888_vm2, %v2977_v6  ;;  %v2978_v42 = vpack.c.bf16 %v7736_v23, %v7734_v21 }
 0x293   : > { %v2654_v16 = vmax.f32 %v2626_v18, 0.0  ;;  %v2627_v10 = vadd.f32 %v6254_v22, %v7600_v37 }
 0x294   : > { %v2652_v30 = vmax.f32 %v2624_v13, 0.0  ;;  %v2625_v24 = vadd.f32 %v6255_v29, %v7600_v37  ;;  %6030 = vmatprep.mubr.msk.bf16.mxu1 %vm2888_vm2, %v2978_v42 }
 0x295   : > { %v2882_v39 = vmul.f32 %v6725_v17, %v2654_v16  ;;  %v2655_v45 = vmax.f32 %v2627_v10, 0.0 }
 0x296   : > { %v2880_v47 = vmul.f32 %v6720_v36, %v2652_v30  ;;  %v2653_v48 = vmax.f32 %v2625_v24, 0.0  ;;  %v6012_v52 = vpop.f32.mrb[24].mxu0  ;;  %v7792_v24 = vld [vmem:[#allocation2 + $0x90] sm:$0xff] }
 0x297   : > { %2911 = vst.msk [vmem:[#allocation2 + $0xb0] sm:$0xff] %vm2888_vm2, %v2882_v39  ;;  %v2883_v15 = vmul.f32 %v6729_v8, %v2655_v45  ;;  %v2554_v55 = vpop.f32.mrb[25].mxu0  ;;  %v7763_v58 = vld [vmem:[#allocation2 + $0x79] sm:$0xff]  ;;  %v6730_v8 = vunpack.i.h.bf16 %v7742_v25  ;;  %v7803_v52 = vld [vmem:[#allocation2 + $0x4a] sm:$0xff] }
 0x298   : > { %v7765_v61 = vld [vmem:[#allocation2 + $0x80] sm:$0xff]  ;;  %2909 = vst.msk [vmem:[#allocation2 + $0xa0] sm:$0xff] %vm2888_vm2, %v2880_v47  ;;  %v2881_v6 = vmul.f32 %v6724_v56, %v2653_v48  ;;  %v6257_v18 = vadd.f32 %v2554_v55, %v7587_v62  ;;  %v6013_v22 = vpop.f32.mrb[26].mxu0  ;;  %v2979_v12 = vpack.c.bf16 %v7763_v58, %v7755_v5  ;;  %v7790_v30 = vld [vmem:[#allocation2 + $0x91] sm:$0xff]  ;;  %v2919_v56 = vld [vmem:[#allocation2 + $0x8] sm:$0xff] }
 0x299   : > { %2912 = vst.msk [vmem:[#allocation2 + $0xb8] sm:$0xff] %vm2888_vm2, %v2883_v15  ;;  %v2557_v13 = vpop.f32.mrb[27].mxu0  ;;  %v7776_v29 = vld [vmem:[#allocation2 + $0x81] sm:$0xff]  ;;  %v7778_v42 = vld [vmem:[#allocation2 + $0x89] sm:$0xff]  ;;  %v7805_v15 = vld [vmem:[#allocation2 + $0x52] sm:$0xff] }
 0x29a   : > { %v7780_v17 = vld [vmem:[#allocation2 + $0x88] sm:$0xff]  ;;  %2910 = vst.msk [vmem:[#allocation2 + $0xa8] sm:$0xff] %vm2888_vm2, %v2881_v6  ;;  %v2628_v62 = vadd.f32 %v6257_v18, %v7600_v37  ;;  %v6259_v10 = vadd.f32 %v2557_v13, %v7589_v35  ;;  %6031 = vmatmul.mubr.msk.bf16.gmra.mrb[40].mxu1 %vm2888_vm2, %v2979_v12  ;;  %v2980_v36 = vpack.c.bf16 %v7778_v42, %v7776_v29  ;;  %v7797_v47 = vld [vmem:[#allocation2 + $0x3a] sm:$0xff]  ;;  %v7807_v55 = vld [vmem:[#allocation2 + $0x72] sm:$0xff]  ;;  %v2848_v13 = vpop.permute.xlu1 %2847 }
 0x29b   : > { %v7799_v35 = vld [vmem:[#allocation2 + $0x42] sm:$0xff]  ;;  %v7813_v18 = vld [vmem:[#allocation2 + $0x6a] sm:$0xff]  ;;  %v7815_v22 = vld [vmem:[#allocation2 + $0x92] sm:$0xff]  ;;  %v2938_v12 = vpack.c.bf16 %v2919_v56, %v2918_v38 }
 0x29c   : > { %v2656_v39 = vmax.f32 %v2628_v62, 0.0  ;;  %v2629_v45 = vadd.f32 %v6259_v10, %v7600_v37  ;;  %6034 = vmatprep.mubr.msk.bf16.mxu1 %vm2888_vm2, %v2980_v36  ;;  %v7811_v6 = vld [vmem:[#allocation2 + $0x62] sm:$0xff]  ;;  %v7823_v36 = vld [vmem:[#allocation2 + $0x8a] sm:$0xff]  ;;  %v7830_v25 = vld [vmem:[#allocation2 + $0x5a] sm:$0xff] }
 0x29d   : > { %v7821_v10 = vld [vmem:[#allocation2 + $0x82] sm:$0xff]  ;;  %v7832_v2 = vld [vmem:[#allocation2 + $0x7a] sm:$0xff] }
 0x29e   : > { %v2884_v37 = vmul.f32 %v6730_v8, %v2656_v39  ;;  %v2657_v19 = vmax.f32 %v2629_v45, 0.0  ;;  %v2921_v56 = vld [vmem:[#allocation2 + $0x18] sm:$0xff]  ;;  %v2922_v8 = vld [vmem:[#allocation2 + $0x20] sm:$0xff] }
 0x29f   : > { %v7819_v62 = vld [vmem:[#allocation2 + $0x99] sm:$0xff]  ;;  %v3521_v51 = vld [vmem:[#allocation2 + $0x84] sm:$0xff] }
 0x2a0   : > { %2913 = vst.msk [vmem:[#allocation2 + $0xc0] sm:$0xff] %vm2888_vm2, %v2884_v37  ;;  %v2885_v39 = vmul.f32 %v2848_v13, %v2657_v19  ;;  %v2981_v45 = vpack.c.bf16 %v7819_v62, %v7790_v30  ;;  %v2920_v13 = vld [vmem:[#allocation2 + $0x10] sm:$0xff]  ;;  %v3301_v19 = vld [vmem:[#allocation2 + $0x22] sm:$0xff] }
 0x2a1   : > { %v2939_v20 = vpack.c.bf16 %v2921_v56, %v2920_v13  ;;  %v2941_v56 = vpack.c.bf16 %v7686_v44, %v7653_v40  ;;  %v2942_v13 = vpack.c.bf16 %v7695_v50, %v7677_v14  ;;  %v3299_v37 = vld [vmem:[#allocation2 + $0x12] sm:$0xff]  ;;  %v8173_v40 = vpack.c.bf16 %v7721_v3, %v7729_v0  ;;  %v4152_v50 = vld [vmem:[#allocation2 + $0xa0] sm:$0xff] }
 0x2a2   : > { %2914 = vst.msk [vmem:[#allocation2 + $0xc8] sm:$0xff] %vm2888_vm2, %v2885_v39  ;;  %6035 = vmatmul.mubr.msk.bf16.gmra.mrb[44].mxu1 %vm2888_vm2, %v2981_v45  ;;  %v6741_v39 = vld [vmem:[%s8134_s3 + $0x28] sm:$0xff]   ;;  %v2940_v45 = vpack.c.bf16 %v7642_v1, %v2922_v8  ;;  %v2945_v8 = vpack.c.bf16 %v7773_v4, %v7751_v63  ;;  %v3523_v31 = vld [vmem:[#allocation2 + $0x94] sm:$0xff]  ;;  %v6752_v1 = vld [vmem:[%s8134_s3 + $0x80] sm:$0xff]   ;;  %v8175_v14 = vpack.c.bf16 %v7765_v61, %v7773_v4 }
 0x2a3   : > { %6042 = vmatprep.mubr.msk.bf16.mxu1 %vm2888_vm2, %v2938_v12  ;;  %v6742_v12 = vld [vmem:[%s8134_s3 + $0x30] sm:$0xff]   ;;  %v8176_v44 = vpack.c.bf16 %v7792_v24, %v7780_v17  ;;  %v6753_v4 = vld [vmem:[%s8134_s3 + $0x88] sm:$0xff]  }
 0x2aa   : > { %6043 = vmatmul.mubr.msk.bf16.vlgmr.msra.gmra.mrb[28].mxu1 %vm2888_vm2, %v2939_v20  ;;  %v2944_v20 = vpack.c.bf16 %v7738_v26, %v7721_v3 }
 0x2ab   : > { %6063 = vmatpush3.bf16.msra.mxu1 %v7662_v53  ;;  %6046 = vmatprep.mubr.msk.bf16.mxu1 %vm2888_vm2, %v2940_v45  ;;  %v2943_v53 = vpack.c.bf16 %v7729_v0, %v7706_v32  ;;  %v7875_v45 = vld [vmem:[#allocation2 + $0x98] sm:$0xff]  ;;  %v4156_v0 = vld [vmem:[#allocation2 + $0xc0] sm:$0xff] }
 0x2ac   : > { %6064 = vmatprep.subr.bf16.mxu1 %v6741_v39  ;;  %v2947_v38 = vpack.c.bf16 %v7875_v45, %v7792_v24  ;;  %v4164_v32 = vpack.c.bf16 %v4152_v50, %v7875_v45  ;;  %v8179_v24 = vpack.c.bf16 %v7711_v7, %v7693_v27  ;;  %v4362_v27 = vld [vmem:[#allocation2 + $0xa1] sm:$0xff]  ;;  %v4363_v7 = vld [vmem:[#allocation2 + $0xa9] sm:$0xff] }
 0x2af   : > { %6065 = vmatpush3.bf16.msra.mxu1 %v6741_v39  ;;  %v2946_v39 = vpack.c.bf16 %v7780_v17, %v7765_v61  ;;  %v8177_v61 = vpack.c.bf16 %v7651_v46, %v7640_v43  ;;  %v8178_v17 = vpack.c.bf16 %v7691_v11, %v7675_v57  ;;  %v8180_v43 = vpack.c.bf16 %v7734_v21, %v7719_v59  ;;  %v4364_v59 = vld [vmem:[#allocation2 + $0xb1] sm:$0xff] }
 0x2b0   : > { %6086 = vmatprep.subr.bf16.mxu1 %v6742_v12  ;;  %v8181_v46 = vpack.c.bf16 %v7755_v5, %v7736_v23  ;;  %v8182_v57 = vpack.c.bf16 %v7776_v29, %v7763_v58  ;;  %v8183_v11 = vpack.c.bf16 %v7790_v30, %v7778_v42  ;;  %v4374_v21 = vpack.c.bf16 %v4362_v27, %v7819_v62  ;;  %v4366_v23 = vld [vmem:[#allocation2 + $0xc1] sm:$0xff]  ;;  %v4365_v5 = vld [vmem:[#allocation2 + $0xb9] sm:$0xff] }
 0x2b1   : > { %v4375_v45 = vpack.c.bf16 %v4364_v59, %v4363_v7  ;;  %v4376_v58 = vpack.c.bf16 %v4366_v23, %v4365_v5  ;;  %v8184_v29 = vpack.c.bf16 %v7666_v34, %v7664_v49  ;;  %v8185_v42 = vpack.c.bf16 %v7799_v35, %v7797_v47 }
 0x2b2   : > { %6047 = vmatmul.mubr.msk.bf16.gmra.mrb[32].mxu1 %vm2888_vm2, %v2941_v56  ;;  %v3297_v56 = vld [vmem:[#allocation2 + $0x2] sm:$0xff]  ;;  %v8186_v30 = vpack.c.bf16 %v7805_v15, %v7803_v52  ;;  %v8187_v62 = vpack.c.bf16 %v7811_v6, %v7830_v25 }
 0x2b3   : > { %6050 = vmatprep.mubr.msk.bf16.mxu1 %vm2888_vm2, %v2942_v13  ;;  %v3298_v13 = vld [vmem:[#allocation2 + $0xa] sm:$0xff] }
 0x2ba   : > { %6051 = vmatmul.mubr.msk.bf16.gmra.mrb[36].mxu1 %vm2888_vm2, %v2943_v53  ;;  %v3317_v53 = vpack.c.bf16 %v3298_v13, %v3297_v56  ;;  %v3321_v56 = vpack.c.bf16 %v7803_v52, %v7799_v35  ;;  %v3325_v13 = vpack.c.bf16 %v7823_v36, %v7821_v10  ;;  %v4572_v35 = vld [vmem:[#allocation2 + $0xa2] sm:$0xff]  ;;  %v4573_v52 = vld [vmem:[#allocation2 + $0xaa] sm:$0xff] }
 0x2bb   : > { %6054 = vmatprep.mubr.msk.bf16.mxu1 %vm2888_vm2, %v2944_v20  ;;  %v3300_v20 = vld [vmem:[#allocation2 + $0x1a] sm:$0xff] }
 0x2bc   : > { %v3318_v60 = vpack.c.bf16 %v3300_v20, %v3299_v37  ;;  %v3320_v37 = vpack.c.bf16 %v7797_v47, %v7666_v34  ;;  %v3508_v20 = vld [vmem:[#allocation2 + $0x1c] sm:$0xff]  ;;  %v8189_v34 = vpack.c.bf16 %v7821_v10, %v7832_v2  ;;  %v8190_v47 = vpack.c.bf16 %v7815_v22, %v7823_v36 }
 0x2c2   : > { %6055 = vmatmul.mubr.msk.bf16.gmra.mrb[40].mxu1 %vm2888_vm2, %v2945_v8  ;;  %v6743_v8 = vld [vmem:[%s8134_s3 + $0x38] sm:$0xff]  }
 0x2c3   : > { %6058 = vmatprep.mubr.msk.bf16.mxu1 %vm2888_vm2, %v2946_v39  ;;  %v3319_v39 = vpack.c.bf16 %v7664_v49, %v3301_v19  ;;  %v3323_v19 = vpack.c.bf16 %v7813_v18, %v7811_v6  ;;  %v8188_v49 = vpack.c.bf16 %v7807_v55, %v7813_v18 }
 0x2ca   : > { %6059 = vmatmul.mubr.msk.bf16.gmra.mrb[44].mxu1 %vm2888_vm2, %v2947_v38  ;;  %v6744_v38 = vld [vmem:[%s8134_s3 + $0x40] sm:$0xff]  }
 0x2cb   : > { %6066 = vmatprep.mubr.msk.bf16.mxu1 %vm2888_vm2, %v3317_v53  ;;  %v7908_v53 = vld [vmem:[#allocation2 + $0x9a] sm:$0xff] }
 0x2d2   : > { %6067 = vmatmul.mubr.msk.bf16.vlgmr.msra.gmra.mrb[28].mxu1 %vm2888_vm2, %v3318_v60  ;;  %v3322_v60 = vpack.c.bf16 %v7830_v25, %v7805_v15  ;;  %v4574_v15 = vld [vmem:[#allocation2 + $0xb2] sm:$0xff]  ;;  %v4584_v25 = vpack.c.bf16 %v4572_v35, %v7908_v53 }
 0x2d3   : > { %6087 = vmatpush3.bf16.msra.mxu1 %v6742_v12  ;;  %6070 = vmatprep.mubr.msk.bf16.mxu1 %vm2888_vm2, %v3319_v39  ;;  %v3324_v12 = vpack.c.bf16 %v7832_v2, %v7807_v55  ;;  %v3507_v39 = vld [vmem:[#allocation2 + $0x14] sm:$0xff]  ;;  %v4585_v6 = vpack.c.bf16 %v4574_v15, %v4573_v52  ;;  %v4576_v55 = vld [vmem:[#allocation2 + $0xc2] sm:$0xff] }
 0x2d4   : > { %6088 = vmatprep.subr.bf16.mxu1 %v6743_v8  ;;  %v4575_v2 = vld [vmem:[#allocation2 + $0xba] sm:$0xff] }
 0x2d5   : > { %v4586_v18 = vpack.c.bf16 %v4576_v55, %v4575_v2 }
 0x2d7   : > { %6089 = vmatpush3.bf16.msra.mxu1 %v6743_v8  ;;  %v3326_v8 = vpack.c.bf16 %v7908_v53, %v7815_v22  ;;  %v5434_v22 = vld [vmem:[%s8135_s4] ss:$0 sm:$0xff] }
 0x2d8   : > { %6110 = vmatprep.subr.bf16.mxu1 %v6744_v38 }
 0x2da   : > { %6071 = vmatmul.mubr.msk.bf16.gmra.mrb[32].mxu1 %vm2888_vm2, %v3320_v37  ;;  %v3527_v37 = vpack.c.bf16 %v3508_v20, %v3507_v39  ;;  %v6746_v20 = vld [vmem:[%s8134_s3 + $0x50] sm:$0xff]  }
 0x2db   : > { %6074 = vmatprep.mubr.msk.bf16.mxu1 %vm2888_vm2, %v3321_v56  ;;  %v3509_v56 = vld [vmem:[#allocation2 + $0x24] sm:$0xff]  ;;  %v3514_v39 = vld [vmem:[#allocation2 + $0x4c] sm:$0xff] }
 0x2e2   : > { %6075 = vmatmul.mubr.msk.bf16.gmra.mrb[36].mxu1 %vm2888_vm2, %v3322_v60  ;;  %v3510_v60 = vld [vmem:[#allocation2 + $0x2c] sm:$0xff] }
 0x2e3   : > { %6078 = vmatprep.mubr.msk.bf16.mxu1 %vm2888_vm2, %v3323_v19  ;;  %v3512_v19 = vld [vmem:[#allocation2 + $0x3c] sm:$0xff]  ;;  %v3528_v41 = vpack.c.bf16 %v3510_v60, %v3509_v56  ;;  %v3515_v60 = vld [vmem:[#allocation2 + $0x54] sm:$0xff] }
 0x2ea   : > { %6079 = vmatmul.mubr.msk.bf16.gmra.mrb[40].mxu1 %vm2888_vm2, %v3324_v12  ;;  %v6745_v12 = vld [vmem:[%s8134_s3 + $0x48] sm:$0xff]  }
 0x2eb   : > { %6082 = vmatprep.mubr.msk.bf16.mxu1 %vm2888_vm2, %v3325_v13  ;;  %v3529_v13 = vpack.c.bf16 %v3512_v19, %v3511_v33  ;;  %v3517_v33 = vld [vmem:[#allocation2 + $0x64] sm:$0xff] }
 0x2f2   : > { %6083 = vmatmul.mubr.msk.bf16.gmra.mrb[44].mxu1 %vm2888_vm2, %v3326_v8  ;;  %v3513_v8 = vld [vmem:[#allocation2 + $0x44] sm:$0xff] }
 0x2f3   : > { %6090 = vmatprep.mubr.msk.bf16.mxu1 %vm2888_vm2, %v3527_v37  ;;  %v3516_v37 = vld [vmem:[#allocation2 + $0x5c] sm:$0xff]  ;;  %v3530_v56 = vpack.c.bf16 %v3514_v39, %v3513_v8 }
 0x2f4   : > { %v3531_v48 = vpack.c.bf16 %v3516_v37, %v3515_v60  ;;  %v3524_v8 = vld [vmem:[#allocation2 + $0x9c] sm:$0xff] }
 0x2f5   : > { %v3535_v37 = vpack.c.bf16 %v3524_v8, %v3523_v31  ;;  %v3718_v60 = vld [vmem:[#allocation2 + $0x1d] sm:$0xff] }
 0x2f6   : > { %v6747_v31 = vld [vmem:[%s8134_s3 + $0x58] sm:$0xff]  }
 0x2fa   : > { %6091 = vmatmul.mubr.msk.bf16.vlgmr.msra.gmra.mrb[28].mxu1 %vm2888_vm2, %v3528_v41  ;;  %v3518_v41 = vld [vmem:[#allocation2 + $0x6c] sm:$0xff] }
 0x2fb   : > { %6111 = vmatpush3.bf16.msra.mxu1 %v6744_v38  ;;  %6094 = vmatprep.mubr.msk.bf16.mxu1 %vm2888_vm2, %v3529_v13  ;;  %v3520_v38 = vld [vmem:[#allocation2 + $0x7c] sm:$0xff]  ;;  %v3532_v19 = vpack.c.bf16 %v3518_v41, %v3517_v33  ;;  %v3519_v13 = vld [vmem:[#allocation2 + $0x74] sm:$0xff] }
 0x2fc   : > { %6112 = vmatprep.subr.bf16.mxu1 %v6745_v12  ;;  %v3533_v16 = vpack.c.bf16 %v3520_v38, %v3519_v13  ;;  %v3717_v41 = vld [vmem:[#allocation2 + $0x15] sm:$0xff]  ;;  %v3722_v13 = vld [vmem:[#allocation2 + $0x3d] sm:$0xff] }
 0x2fd   : > { %v3737_v38 = vpack.c.bf16 %v3718_v60, %v3717_v41 }
 0x2ff   : > { %6113 = vmatpush3.bf16.msra.mxu1 %v6745_v12  ;;  %v3522_v12 = vld [vmem:[#allocation2 + $0x8c] sm:$0xff] }
 0x300   : > { %6134 = vmatprep.subr.bf16.mxu1 %v6746_v20  ;;  %v3534_v39 = vpack.c.bf16 %v3522_v12, %v3521_v51  ;;  %v3721_v12 = vld [vmem:[#allocation2 + $0x35] sm:$0xff] }
 0x301   : > { %v3739_v8 = vpack.c.bf16 %v3722_v13, %v3721_v12  ;;  %v3729_v13 = vld [vmem:[#allocation2 + $0x75] sm:$0xff]  ;;  %v3731_v12 = vld [vmem:[#allocation2 + $0x85] sm:$0xff] }
 0x302   : > { %6095 = vmatmul.mubr.msk.bf16.gmra.mrb[32].mxu1 %vm2888_vm2, %v3530_v56  ;;  %v3526_v56 = vld [vmem:[#allocation2 + $0xac] sm:$0xff] }
 0x303   : > { %6098 = vmatprep.mubr.msk.bf16.mxu1 %vm2888_vm2, %v3531_v48  ;;  %v3525_v48 = vld [vmem:[#allocation2 + $0xa4] sm:$0xff] }
 0x304   : > { %v3536_v33 = vpack.c.bf16 %v3526_v56, %v3525_v48  ;;  %v3724_v48 = vld [vmem:[#allocation2 + $0x4d] sm:$0xff]  ;;  %v3726_v56 = vld [vmem:[#allocation2 + $0x5d] sm:$0xff] }
 0x30a   : > { %6099 = vmatmul.mubr.msk.bf16.gmra.mrb[36].mxu1 %vm2888_vm2, %v3532_v19  ;;  %v3720_v19 = vld [vmem:[#allocation2 + $0x2d] sm:$0xff] }
 0x30b   : > { %6102 = vmatprep.mubr.msk.bf16.mxu1 %vm2888_vm2, %v3533_v16  ;;  %v3719_v16 = vld [vmem:[#allocation2 + $0x25] sm:$0xff] }
 0x30c   : > { %v3738_v51 = vpack.c.bf16 %v3720_v19, %v3719_v16  ;;  %v3730_v16 = vld [vmem:[#allocation2 + $0x7d] sm:$0xff] }
 0x312   : > { %6103 = vmatmul.mubr.msk.bf16.gmra.mrb[40].mxu1 %vm2888_vm2, %v3534_v39  ;;  %v6748_v39 = vld [vmem:[%s8134_s3 + $0x60] sm:$0xff]  }
 0x313   : > { %6106 = vmatprep.mubr.msk.bf16.mxu1 %vm2888_vm2, %v3535_v37  ;;  %v3723_v37 = vld [vmem:[#allocation2 + $0x45] sm:$0xff] }
 0x314   : > { %v3740_v60 = vpack.c.bf16 %v3724_v48, %v3723_v37  ;;  %v3733_v48 = vld [vmem:[#allocation2 + $0x95] sm:$0xff] }
 0x31a   : > { %6107 = vmatmul.mubr.msk.bf16.gmra.mrb[44].mxu1 %vm2888_vm2, %v3536_v33  ;;  %v3725_v33 = vld [vmem:[#allocation2 + $0x55] sm:$0xff] }
 0x31b   : > { %6114 = vmatprep.mubr.msk.bf16.mxu1 %vm2888_vm2, %v3737_v38  ;;  %v3741_v41 = vpack.c.bf16 %v3726_v56, %v3725_v33  ;;  %v3728_v38 = vld [vmem:[#allocation2 + $0x6d] sm:$0xff] }
 0x31c   : > { %v3736_v33 = vld [vmem:[#allocation2 + $0xad] sm:$0xff] }
 0x322   : > { %6115 = vmatmul.mubr.msk.bf16.vlgmr.msra.gmra.mrb[28].mxu1 %vm2888_vm2, %v3738_v51  ;;  %v3743_v51 = vpack.c.bf16 %v3730_v16, %v3729_v13  ;;  %v3930_v13 = vld [vmem:[#allocation2 + $0x2e] sm:$0xff] }
 0x323   : > { %6135 = vmatpush3.bf16.msra.mxu1 %v6746_v20  ;;  %6118 = vmatprep.mubr.msk.bf16.mxu1 %vm2888_vm2, %v3739_v8  ;;  %v3727_v20 = vld [vmem:[#allocation2 + $0x65] sm:$0xff]  ;;  %v3734_v8 = vld [vmem:[#allocation2 + $0x9d] sm:$0xff] }
 0x324   : > { %6136 = vmatprep.subr.bf16.mxu1 %v6747_v31  ;;  %v3742_v19 = vpack.c.bf16 %v3728_v38, %v3727_v20  ;;  %v3745_v56 = vpack.c.bf16 %v3734_v8, %v3733_v48  ;;  %v3927_v38 = vld [vmem:[#allocation2 + $0x16] sm:$0xff]  ;;  %v6749_v8 = vld [vmem:[%s8134_s3 + $0x68] sm:$0xff]  }
 0x325   : > { %v6750_v48 = vld [vmem:[%s8134_s3 + $0x70] sm:$0xff]  }
 0x327   : > { %6137 = vmatpush3.bf16.msra.mxu1 %v6747_v31  ;;  %v3732_v31 = vld [vmem:[#allocation2 + $0x8d] sm:$0xff] }
 0x328   : > { %6158 = vmatprep.subr.bf16.mxu1 %v6748_v39  ;;  %v3744_v37 = vpack.c.bf16 %v3732_v31, %v3731_v12  ;;  %v3931_v31 = vld [vmem:[#allocation2 + $0x36] sm:$0xff] }
 0x32a   : > { %6119 = vmatmul.mubr.msk.bf16.gmra.mrb[32].mxu1 %vm2888_vm2, %v3740_v60  ;;  %v3735_v60 = vld [vmem:[#allocation2 + $0xa5] sm:$0xff] }
 0x32b   : > { %6122 = vmatprep.mubr.msk.bf16.mxu1 %vm2888_vm2, %v3741_v41  ;;  %v3928_v41 = vld [vmem:[#allocation2 + $0x1e] sm:$0xff]  ;;  %v3746_v20 = vpack.c.bf16 %v3736_v33, %v3735_v60  ;;  %v3934_v60 = vld [vmem:[#allocation2 + $0x4e] sm:$0xff] }
 0x32c   : > { %v3947_v16 = vpack.c.bf16 %v3928_v41, %v3927_v38  ;;  %v3936_v33 = vld [vmem:[#allocation2 + $0x5e] sm:$0xff] }
 0x332   : > { %6123 = vmatmul.mubr.msk.bf16.gmra.mrb[36].mxu1 %vm2888_vm2, %v3742_v19  ;;  %v3929_v19 = vld [vmem:[#allocation2 + $0x26] sm:$0xff] }
 0x333   : > { %6126 = vmatprep.mubr.msk.bf16.mxu1 %vm2888_vm2, %v3743_v51  ;;  %v3932_v51 = vld [vmem:[#allocation2 + $0x3e] sm:$0xff]  ;;  %v3948_v12 = vpack.c.bf16 %v3930_v13, %v3929_v19 }
 0x334   : > { %v3940_v19 = vld [vmem:[#allocation2 + $0x7e] sm:$0xff] }
 0x33a   : > { %6127 = vmatmul.mubr.msk.bf16.gmra.mrb[40].mxu1 %vm2888_vm2, %v3744_v37  ;;  %v3949_v37 = vpack.c.bf16 %v3932_v51, %v3931_v31  ;;  %v3939_v51 = vld [vmem:[#allocation2 + $0x76] sm:$0xff]  ;;  %v3941_v31 = vld [vmem:[#allocation2 + $0x86] sm:$0xff] }
 0x33b   : > { %6130 = vmatprep.mubr.msk.bf16.mxu1 %vm2888_vm2, %v3745_v56  ;;  %v3933_v56 = vld [vmem:[#allocation2 + $0x46] sm:$0xff] }
 0x33c   : > { %v3950_v41 = vpack.c.bf16 %v3934_v60, %v3933_v56  ;;  %v3943_v60 = vld [vmem:[#allocation2 + $0x96] sm:$0xff] }
 0x342   : > { %6131 = vmatmul.mubr.msk.bf16.gmra.mrb[44].mxu1 %vm2888_vm2, %v3746_v20  ;;  %v3935_v20 = vld [vmem:[#allocation2 + $0x56] sm:$0xff] }
 0x343   : > { %6138 = vmatprep.mubr.msk.bf16.mxu1 %vm2888_vm2, %v3947_v16  ;;  %v3951_v38 = vpack.c.bf16 %v3936_v33, %v3935_v20  ;;  %v3938_v16 = vld [vmem:[#allocation2 + $0x6e] sm:$0xff] }
 0x344   : > { %v3946_v20 = vld [vmem:[#allocation2 + $0xae] sm:$0xff] }
 0x34a   : > { %6139 = vmatmul.mubr.msk.bf16.vlgmr.msra.gmra.mrb[28].mxu1 %vm2888_vm2, %v3948_v12  ;;  %v3953_v12 = vpack.c.bf16 %v3940_v19, %v3939_v51 }
 0x34b   : > { %6159 = vmatpush3.bf16.msra.mxu1 %v6748_v39  ;;  %6142 = vmatprep.mubr.msk.bf16.mxu1 %vm2888_vm2, %v3949_v37  ;;  %v3937_v39 = vld [vmem:[#allocation2 + $0x66] sm:$0xff]  ;;  %v3944_v37 = vld [vmem:[#allocation2 + $0x9e] sm:$0xff] }
 0x34c   : > { %6160 = vmatprep.subr.bf16.mxu1 %v6749_v8  ;;  %v3952_v13 = vpack.c.bf16 %v3938_v16, %v3937_v39  ;;  %v3955_v33 = vpack.c.bf16 %v3944_v37, %v3943_v60  ;;  %v6751_v39 = vld [vmem:[%s8134_s3 + $0x78] sm:$0xff]  }
 0x34f   : > { %6161 = vmatpush3.bf16.msra.mxu1 %v6749_v8  ;;  %v3942_v8 = vld [vmem:[#allocation2 + $0x8e] sm:$0xff] }
 0x350   : > { %6182 = vmatprep.subr.bf16.mxu1 %v6750_v48  ;;  %v3954_v56 = vpack.c.bf16 %v3942_v8, %v3941_v31 }
 0x352   : > { %6143 = vmatmul.mubr.msk.bf16.gmra.mrb[32].mxu1 %vm2888_vm2, %v3950_v41  ;;  %v3945_v41 = vld [vmem:[#allocation2 + $0xa6] sm:$0xff] }
 0x353   : > { %6146 = vmatprep.mubr.msk.bf16.mxu1 %vm2888_vm2, %v3951_v38  ;;  %v3956_v38 = vpack.c.bf16 %v3946_v20, %v3945_v41 }
 0x35a   : > { %6147 = vmatmul.mubr.msk.bf16.gmra.mrb[36].mxu1 %vm2888_vm2, %v3952_v13 }
 0x35b   : > { %6150 = vmatprep.mubr.msk.bf16.mxu1 %vm2888_vm2, %v3953_v12 }
 0x362   : > { %6151 = vmatmul.mubr.msk.bf16.gmra.mrb[40].mxu1 %vm2888_vm2, %v3954_v56 }
 0x363   : > { %6154 = vmatprep.mubr.msk.bf16.mxu1 %vm2888_vm2, %v3955_v33 }
 0x36a   : > { %6155 = vmatmul.mubr.msk.bf16.gmra.mrb[44].mxu1 %vm2888_vm2, %v3956_v38 }
 0x36b   : > { %6162 = vmatprep.mubr.msk.bf16.mxu1 %vm2888_vm2, %v4157_v54  ;;  %v8174_v54 = vpack.c.bf16 %v7751_v63, %v7738_v26  ;;  %v4155_v26 = vld [vmem:[#allocation2 + $0xb8] sm:$0xff] }
 0x36c   : > { %v4166_v63 = vpack.c.bf16 %v4156_v0, %v4155_v26 }
 0x372   : > { %6163 = vmatmul.mubr.msk.bf16.vlgmr.msra.gmra.mrb[28].mxu1 %vm2888_vm2, %v4158_v28  ;;  %v4153_v28 = vld [vmem:[#allocation2 + $0xa8] sm:$0xff] }
 0x373   : > { %6183 = vmatpush3.bf16.msra.mxu1 %v6750_v48  ;;  %6166 = vmatprep.mubr.msk.bf16.mxu1 %vm2888_vm2, %v4159_v9  ;;  %v4154_v9 = vld [vmem:[#allocation2 + $0xb0] sm:$0xff] }
 0x374   : > { %6184 = vmatprep.subr.bf16.mxu1 %v6751_v39  ;;  %v4165_v3 = vpack.c.bf16 %v4154_v9, %v4153_v28 }
 0x377   : > { %6185 = vmatpush3.bf16.msra.mxu1 %v6751_v39 }
 0x378   : > { %6206 = vmatprep.subr.bf16.mxu1 %v6752_v1 }
 0x37a   : > { %6167 = vmatmul.mubr.msk.bf16.gmra.mrb[32].mxu1 %vm2888_vm2, %v8173_v40 }
 0x37b   : > { %6170 = vmatprep.mubr.msk.bf16.mxu1 %vm2888_vm2, %v8174_v54 }
 0x382   : > { %6171 = vmatmul.mubr.msk.bf16.gmra.mrb[36].mxu1 %vm2888_vm2, %v8175_v14 }
 0x383   : > { %6174 = vmatprep.mubr.msk.bf16.mxu1 %vm2888_vm2, %v8176_v44 }
 0x38a   : > { %6175 = vmatmul.mubr.msk.bf16.gmra.mrb[40].mxu1 %vm2888_vm2, %v4164_v32 }
 0x38b   : > { %6178 = vmatprep.mubr.msk.bf16.mxu1 %vm2888_vm2, %v4165_v3 }
 0x392   : > { %6179 = vmatmul.mubr.msk.bf16.gmra.mrb[44].mxu1 %vm2888_vm2, %v4166_v63 }
 0x393   : > { %6186 = vmatprep.mubr.msk.bf16.mxu1 %vm2888_vm2, %v8177_v61 }
 0x39a   : > { %6187 = vmatmul.mubr.msk.bf16.vlgmr.msra.gmra.mrb[28].mxu1 %vm2888_vm2, %v8178_v17 }
 0x39b   : > { %6207 = vmatpush3.bf16.msra.mxu1 %v6752_v1  ;;  %6190 = vmatprep.mubr.msk.bf16.mxu1 %vm2888_vm2, %v8179_v24 }
 0x39c   : > { %6208 = vmatprep.subr.bf16.mxu1 %v6753_v4 }
 0x39f   : > { %6209 = vmatpush3.bf16.msra.mxu1 %v6753_v4 }
 0x3a2   : > { %6191 = vmatmul.mubr.msk.bf16.gmra.mrb[32].mxu1 %vm2888_vm2, %v8180_v43 }
 0x3a3   : > { %6194 = vmatprep.mubr.msk.bf16.mxu1 %vm2888_vm2, %v8181_v46 }
 0x3aa   : > { %6195 = vmatmul.mubr.msk.bf16.gmra.mrb[36].mxu1 %vm2888_vm2, %v8182_v57 }
 0x3ab   : > { %6198 = vmatprep.mubr.msk.bf16.mxu1 %vm2888_vm2, %v8183_v11 }
 0x3b2   : > { %6199 = vmatmul.mubr.msk.bf16.gmra.mrb[40].mxu1 %vm2888_vm2, %v4374_v21 }
 0x3b3   : > { %6202 = vmatprep.mubr.msk.bf16.mxu1 %vm2888_vm2, %v4375_v45 }
 0x3ba   : > { %6203 = vmatmul.mubr.msk.bf16.gmra.mrb[44].mxu1 %vm2888_vm2, %v4376_v58 }
 0x3bb   : > { %6210 = vmatprep.mubr.msk.bf16.mxu1 %vm2888_vm2, %v8184_v29 }
 0x3c2   : > { %6211 = vmatmul.mubr.msk.bf16.vlgmr.msra.gmra.mrb[28].mxu1 %vm2888_vm2, %v8185_v42 }
 0x3c3   : > { %6214 = vmatprep.mubr.msk.bf16.mxu1 %vm2888_vm2, %v8186_v30 }
 0x3ca   : > { %6215 = vmatmul.mubr.msk.bf16.gmra.mrb[32].mxu1 %vm2888_vm2, %v8187_v62 }
 0x3cb   : > { %6218 = vmatprep.mubr.msk.bf16.mxu1 %vm2888_vm2, %v8188_v49 }
 0x3d2   : > { %6219 = vmatmul.mubr.msk.bf16.gmra.mrb[36].mxu1 %vm2888_vm2, %v8189_v34 }
 0x3d3   : > { %6222 = vmatprep.mubr.msk.bf16.mxu1 %vm2888_vm2, %v8190_v47 }
 0x3da   : > { %6223 = vmatmul.mubr.msk.bf16.gmra.mrb[40].mxu1 %vm2888_vm2, %v4584_v25 }
 0x3db   : > { %6226 = vmatprep.mubr.msk.bf16.mxu1 %vm2888_vm2, %v4585_v6 }
 0x3e2   : > { %6227 = vmatmul.mubr.msk.bf16.gmra.mrb[44].mxu1 %vm2888_vm2, %v4586_v18 }
 0x495   : > { %v6212_v10 = vpop.f32.mrb[28].mxu1 }
 0x496   : > { %v4776_v36 = vadd.f32 %v6212_v10, %v5434_v22  ;;  %v4668_v53 = vpop.f32.mrb[29].mxu1 }
 0x497   : > { %v4774_v48 = vadd.f32 %v5434_v22, %v4668_v53  ;;  %v6213_v16 = vpop.f32.mrb[30].mxu1 }
 0x498   : > { %4797 = vst.msk [vmem:[%s8074_s12 + $0x10] sm:$0xff] %vm4794_vm3, %v4776_v36  ;;  %v4777_v19 = vadd.f32 %v6213_v16, %v5434_v22  ;;  %v4671_v13 = vpop.f32.mrb[31].mxu1 }
 0x499   : > { %4795 = vst.msk [vmem:[%s8074_s12] sm:$0xff] %vm4794_vm3, %v4774_v48  ;;  %v4775_v51 = vadd.f32 %v5434_v22, %v4671_v13 }
 0x49a   : > { %4798 = vst.msk [vmem:[%s8074_s12 + $0x18] sm:$0xff] %vm4794_vm3, %v4777_v19 }
 0x49b   : > { %4796 = vst.msk [vmem:[%s8074_s12 + $0x8] sm:$0xff] %vm4794_vm3, %v4775_v51 }
 0x49d   : > { %v6216_v12 = vpop.f32.mrb[32].mxu1 }
 0x49e   : > { %v4780_v31 = vadd.f32 %v6216_v12, %v5434_v22  ;;  %v4684_v8 = vpop.f32.mrb[33].mxu1 }
 0x49f   : > { %v4778_v37 = vadd.f32 %v5434_v22, %v4684_v8  ;;  %v6217_v56 = vpop.f32.mrb[34].mxu1 }
 0x4a0   : > { %4801 = vst.msk [vmem:[%s8074_s12 + $0x30] sm:$0xff] %vm4794_vm3, %v4780_v31  ;;  %v4781_v60 = vadd.f32 %v6217_v56, %v5434_v22  ;;  %v4687_v33 = vpop.f32.mrb[35].mxu1 }
 0x4a1   : > { %4799 = vst.msk [vmem:[%s8074_s12 + $0x20] sm:$0xff] %vm4794_vm3, %v4778_v37  ;;  %v4779_v41 = vadd.f32 %v5434_v22, %v4687_v33 }
 0x4a2   : > { %4802 = vst.msk [vmem:[%s8074_s12 + $0x38] sm:$0xff] %vm4794_vm3, %v4781_v60 }
 0x4a3   : > { %4800 = vst.msk [vmem:[%s8074_s12 + $0x28] sm:$0xff] %vm4794_vm3, %v4779_v41 }
 0x4a5   : > { %v6220_v20 = vpop.f32.mrb[36].mxu1 }
 0x4a6   : > { %v4784_v38 = vadd.f32 %v6220_v20, %v5434_v22  ;;  %v4700_v39 = vpop.f32.mrb[37].mxu1 }
 0x4a7   : > { %v4782_v1 = vadd.f32 %v5434_v22, %v4700_v39  ;;  %v6221_v40 = vpop.f32.mrb[38].mxu1 }
 0x4a8   : > { %4805 = vst.msk [vmem:[%s8074_s12 + $0x50] sm:$0xff] %vm4794_vm3, %v4784_v38  ;;  %v4785_v54 = vadd.f32 %v6221_v40, %v5434_v22  ;;  %v4703_v14 = vpop.f32.mrb[39].mxu1 }
 0x4a9   : > { %4803 = vst.msk [vmem:[%s8074_s12 + $0x40] sm:$0xff] %vm4794_vm3, %v4782_v1  ;;  %v4783_v44 = vadd.f32 %v5434_v22, %v4703_v14 }
 0x4aa   : > { %4806 = vst.msk [vmem:[%s8074_s12 + $0x58] sm:$0xff] %vm4794_vm3, %v4785_v54 }
 0x4ab   : > { %4804 = vst.msk [vmem:[%s8074_s12 + $0x48] sm:$0xff] %vm4794_vm3, %v4783_v44 }
 0x4ad   : > { %v6224_v50 = vpop.f32.mrb[40].mxu1 }
 0x4ae   : > { %v4788_v28 = vadd.f32 %v6224_v50, %v5434_v22  ;;  %v4716_v32 = vpop.f32.mrb[41].mxu1 }
 0x4af   : > { %v4786_v9 = vadd.f32 %v5434_v22, %v4716_v32  ;;  %v6225_v3 = vpop.f32.mrb[42].mxu1 }
 0x4b0   : > { %4809 = vst.msk [vmem:[%s8074_s12 + $0x70] sm:$0xff] %vm4794_vm3, %v4788_v28  ;;  %v4789_v0 = vadd.f32 %v6225_v3, %v5434_v22  ;;  %v4719_v26 = vpop.f32.mrb[43].mxu1 }
 0x4b1   : > { %4807 = vst.msk [vmem:[%s8074_s12 + $0x60] sm:$0xff] %vm4794_vm3, %v4786_v9  ;;  %v4787_v63 = vadd.f32 %v5434_v22, %v4719_v26 }
 0x4b2   : > { %4810 = vst.msk [vmem:[%s8074_s12 + $0x78] sm:$0xff] %vm4794_vm3, %v4789_v0 }
 0x4b3   : > { %4808 = vst.msk [vmem:[%s8074_s12 + $0x68] sm:$0xff] %vm4794_vm3, %v4787_v63 }
 0x4b5   : > { %v6228_v61 = vpop.f32.mrb[44].mxu1 }
 0x4b6   : > { %v4792_v4 = vadd.f32 %v6228_v61, %v5434_v22  ;;  %v4732_v17 = vpop.f32.mrb[45].mxu1 }
 0x4b7   : > { %v4790_v24 = vadd.f32 %v5434_v22, %v4732_v17  ;;  %v6229_v43 = vpop.f32.mrb[46].mxu1 }
 0x4b8   : > { %4813 = vst.msk [vmem:[%s8074_s12 + $0x90] sm:$0xff] %vm4794_vm3, %v4792_v4  ;;  %v4793_v46 = vadd.f32 %v6229_v43, %v5434_v22  ;;  %v4735_v57 = vpop.f32.mrb[47].mxu1 }
 0x4b9   : > { %4811 = vst.msk [vmem:[%s8074_s12 + $0x80] sm:$0xff] %vm4794_vm3, %v4790_v24  ;;  %v4791_v11 = vadd.f32 %v5434_v22, %v4735_v57 }
 0x4ba   : > { %4814 = vst.msk [vmem:[%s8074_s12 + $0x98] sm:$0xff] %vm4794_vm3, %v4793_v46 }
 0x4bb   : > { %4812 = vst.msk [vmem:[%s8074_s12 + $0x88] sm:$0xff] %vm4794_vm3, %v4791_v11 }
 0x4bc PF: > { %s16_s25 = sadd.s32 1, %s6792_s25   ;;  %s8191_s21 = smov %s6784_s23 }
 0x4bd   : > { %p13_p7 = scmp.ge.s32.totalorder %s16_s25, 6   ;;  %s8192_s22 = smov %s6788_s24 }
 0x4be   : > { %s8193_s23 = smov %s8196_s26  ;;  %s8194_s24 = smov %s8200_s27 }
 0x4bf   :  { %15 = sbr.rel (!%p13_p7) target bundleno = 3 (0x3), region = 100 }

</bundles_post_ra>
